<compile_context>
chip_gen: v5e
topology: v5e:2x2
jax: 0.10.0
libtpu: 0.0.40
codegen_flags: <defaults>
</compile_context>

<pallas_src>
import math

import jax
import jax.numpy as jnp
from jax.experimental import pallas as pl
from jax.experimental.pallas import tpu as pltpu


def _round_up(x, m):
    return ((x + m - 1) // m) * m


# ---------------------------------------------------------------------------
# Kernel: fused Linear -> ReLU -> Linear on one row tile.
# ---------------------------------------------------------------------------
def _decoder_mlp_kernel(y_ref, w1_ref, b1_ref, w2_ref, b2_ref, out_ref):
    # y_ref : (TR, NK)     f32  (cast to bf16 here; input traffic is tiny)
    # w1_ref: (NK, HP)     bf16    b1_ref: (1, HP)    f32
    # w2_ref: (HP, IMGP)   bf16    b2_ref: (1, IMGP)  f32
    # out   : (TR, IMGP)   f32 (or bf16)
    y = y_ref[...].astype(jnp.bfloat16)
    h = jnp.dot(y, w1_ref[...], preferred_element_type=jnp.float32)
    h = jnp.maximum(h + b1_ref[...], 0.0)                     # bias + ReLU in f32
    o = jnp.dot(h.astype(jnp.bfloat16), w2_ref[...],
                preferred_element_type=jnp.float32)
    out_ref[...] = (o + b2_ref[...]).astype(out_ref.dtype)


# ---------------------------------------------------------------------------
# Wrapper
# ---------------------------------------------------------------------------
def decoder_forward(y, padded_params, *, N, K, image_size,
                    block_rows=512, out_dtype=jnp.float32):
    """Composed-decoder forward: y.view(-1, N*K) -> MLP -> (B, image_size)."""
    w1, b1, w2, b2 = padded_params
    nk = N * K
    hp = w1.shape[1]          # padded hidden (e.g. 384)
    img_pad = b2.shape[-1]    # padded image  (e.g. 896)

    yf = y.reshape(-1, nk)
    if yf.dtype != jnp.float32:
        yf = yf.astype(jnp.float32)
    B = yf.shape[0]

    # --- row tiling -------------------------------------------------------
    # Sublane-aligned tiles; at least 2 tiles (and an even count) whenever
    # possible so both v7x TensorCores get balanced work.  Cap at block_rows
    # (default 512) so the tile fits the default scoped VMEM on v5e.
    Bp8 = _round_up(B, 8)
    n_tiles = max(1, pl.cdiv(Bp8, block_rows))
    if B > 8 and n_tiles == 1:
        n_tiles = 2
    if n_tiles > 1 and n_tiles % 2 == 1:
        n_tiles += 1
    tr = _round_up(pl.cdiv(Bp8, n_tiles), 8)
    Bp = _round_up(B, tr)
    if Bp != B:
        yf = jnp.pad(yf, ((0, Bp - B), (0, 0)))
    grid = (Bp // tr,)

    out_bytes = jnp.dtype(out_dtype).itemsize
    cost = pl.CostEstimate(
        flops=2 * Bp * (nk * hp + hp * img_pad),
        transcendentals=0,
        bytes_accessed=(Bp * nk * 4                       # input (f32)
                        + (w1.size + w2.size) * 2         # bf16 weights
                        + (b1.size + b2.size) * 4         # f32 biases
                        + Bp * img_pad * out_bytes),      # output
    )

    out = pl.pallas_call(
        _decoder_mlp_kernel,
        out_shape=jax.ShapeDtypeStruct((Bp, img_pad), out_dtype),
        grid=grid,
        in_specs=[
            pl.BlockSpec((tr, nk), lambda i: (i, 0)),
            pl.BlockSpec(w1.shape, lambda i: (0, 0)),   # weights stay resident
            pl.BlockSpec(b1.shape, lambda i: (0, 0)),
            pl.BlockSpec(w2.shape, lambda i: (0, 0)),
            pl.BlockSpec(b2.shape, lambda i: (0, 0)),
        ],
        out_specs=pl.BlockSpec((tr, img_pad), lambda i: (i, 0)),
        compiler_params=pltpu.CompilerParams(
            dimension_semantics=("parallel",)),
        cost_estimate=cost,
    )(yf, w1, b1, w2, b2)

    # Slice off batch padding and the image-dim (784 -> 896) lane padding.
    return out[:B, :image_size]


# ---------------------------------------------------------------------------
# Parameter construction (torch.nn.Linear-like init, then pad + bf16 cast)
# ---------------------------------------------------------------------------
def init_decoder_params(key, *, n_in, hidden, image_size):
    """torch Linear-style uniform(-1/sqrt(fan_in)) init, f32, unpadded."""
    k1, k2, k3, k4 = jax.random.split(key, 4)
    lim1 = 1.0 / math.sqrt(n_in)
    lim2 = 1.0 / math.sqrt(hidden)
    w1 = jax.random.uniform(k1, (n_in, hidden), jnp.float32, -lim1, lim1)
    b1 = jax.random.uniform(k2, (hidden,), jnp.float32, -lim1, lim1)
    w2 = jax.random.uniform(k3, (hidden, image_size), jnp.float32, -lim2, lim2)
    b2 = jax.random.uniform(k4, (image_size,), jnp.float32, -lim2, lim2)
    return w1, b1, w2, b2


def pad_and_cast_params(params, *, hidden_pad, image_pad):
    """Zero-pad hidden (300->384) and image (784->896) dims to multiples of 128
    and cast the matmul operands to bf16.  Results are unchanged: padded hidden
    units have zero weights + zero bias (ReLU(0)=0) and zero w2 rows; padded
    output columns (zero w2 cols + zero b2) are sliced off in the wrapper."""
    w1, b1, w2, b2 = params
    hidden = w1.shape[1]
    img = w2.shape[1]
    hpad = hidden_pad - hidden
    ipad = image_pad - img
    w1p = jnp.pad(w1, ((0, 0), (0, hpad))).astype(jnp.bfloat16)
    b1p = jnp.pad(b1, ((0, hpad),)).reshape(1, hidden_pad).astype(jnp.float32)
    w2p = jnp.pad(w2, ((0, hpad), (0, ipad))).astype(jnp.bfloat16)
    b2p = jnp.pad(b2, ((0, ipad),)).reshape(1, image_pad).astype(jnp.float32)
    return w1p, b1p, w2p, b2p


if __name__ == "__main__":
    # Module defaults: image_size=784, N=6, K=6, hidden=300, composed decoder.
    IMAGE_SIZE, N, K, HIDDEN = 784, 6, 6, 300
    HIDDEN_PAD = 384                      # 300 -> 3*128
    IMAGE_PAD = 896                       # 784 -> 7*128 (lane-dense output)
    B = 64                                # -> 2 row tiles of 32 rows, grid=(2,)

    root = jax.random.PRNGKey(0)
    ky, kp = jax.random.split(root)

    # y plays the role of the (relaxed one-hot) latents fed to the decoder.
    y = jax.random.normal(ky, (B, N, K), dtype=jnp.float32)

    raw = init_decoder_params(kp, n_in=N * K, hidden=HIDDEN,
                              image_size=IMAGE_SIZE)
    params = pad_and_cast_params(raw, hidden_pad=HIDDEN_PAD,
                                 image_pad=IMAGE_PAD)

    out = decoder_forward(y, params, N=N, K=K, image_size=IMAGE_SIZE)
    out = jax.block_until_ready(out)
    assert out.shape == (B, IMAGE_SIZE)

    # Pure-JAX f32 reference of the composed decoder path (bf16 MXU tolerance).
    w1, b1, w2, b2 = raw
    yf = y.reshape(-1, N * K)
    ref = jnp.maximum(yf @ w1 + b1, 0.0) @ w2 + b2
    max_err = float(jnp.max(jnp.abs(out - ref)))
    assert max_err < 8e-2, f"max abs err {max_err}"

    # TODO(synk): composed_decoder=False path (N separate Linear(K,300)->ReLU->
    # Linear(300,image_size) stacks + sigmoid + mean over n) not implemented;
    # this kernel reproduces the module's default composed path (raw logits).

    print("KERNEL_OK")
</pallas_src>

<mosaic_0001>
module attributes {stable_mosaic.version = 11 : i64} {
  func.func @_decoder_mlp_kernel(%arg0: i32, %arg1: memref<32x36xf32, #tpu.memory_space<vmem>>, %arg2: memref<36x384xbf16, #tpu.memory_space<vmem>>, %arg3: memref<1x384xf32, #tpu.memory_space<vmem>>, %arg4: memref<384x896xbf16, #tpu.memory_space<vmem>>, %arg5: memref<1x896xf32, #tpu.memory_space<vmem>>, %arg6: memref<32x896xf32, #tpu.memory_space<vmem>>) attributes {dimension_semantics = [#tpu.dimension_semantics<parallel>], iteration_bounds = array<i64: 2>, scalar_prefetch = 0 : i64, scratch_operands = 0 : i64, tpu.core_type = #tpu.core_type<tc>, window_params = [{transform_indices = @transform_0, window_bounds = array<i64: 32, 36>}, {pipeline_mode = #tpu.pipeline_mode<synchronous>, transform_indices = @transform_1, window_bounds = array<i64: 36, 384>}, {pipeline_mode = #tpu.pipeline_mode<synchronous>, transform_indices = @transform_2, window_bounds = array<i64: 1, 384>}, {pipeline_mode = #tpu.pipeline_mode<synchronous>, transform_indices = @transform_3, window_bounds = array<i64: 384, 896>}, {pipeline_mode = #tpu.pipeline_mode<synchronous>, transform_indices = @transform_4, window_bounds = array<i64: 1, 896>}, {transform_indices = @transform_5, window_bounds = array<i64: 32, 896>}]} {
    %c0 = arith.constant 0 : index
    %c0_0 = arith.constant 0 : index
    %0 = vector.load %arg1[%c0, %c0_0] : memref<32x36xf32, #tpu.memory_space<vmem>>, vector<32x36xf32>
    %1 = arith.truncf %0 : vector<32x36xf32> to vector<32x36xbf16>
    %c0_1 = arith.constant 0 : index
    %c0_2 = arith.constant 0 : index
    %2 = vector.load %arg2[%c0_1, %c0_2] : memref<36x384xbf16, #tpu.memory_space<vmem>>, vector<36x384xbf16>
    %cst = arith.constant dense<0.000000e+00> : vector<32x384xf32>
    %3 = tpu.matmul %1, %2, %cst {dimension_numbers = #tpu.dot_dimension_numbers<[1], [0], [0], [1], [0, 0, 1, 1], [], []>} : vector<32x36xbf16>, vector<36x384xbf16>, vector<32x384xf32> -> vector<32x384xf32>
    %c0_3 = arith.constant 0 : index
    %c0_4 = arith.constant 0 : index
    %4 = vector.load %arg3[%c0_3, %c0_4] : memref<1x384xf32, #tpu.memory_space<vmem>>, vector<1x384xf32>
    %5 = vector.broadcast %4 : vector<1x384xf32> to vector<32x384xf32>
    %6 = arith.addf %3, %5 : vector<32x384xf32>
    %cst_5 = arith.constant 0.000000e+00 : f32
    %7 = vector.broadcast %cst_5 : f32 to vector<32x384xf32>
    %8 = arith.maximumf %6, %7 : vector<32x384xf32>
    %9 = arith.truncf %8 : vector<32x384xf32> to vector<32x384xbf16>
    %c0_6 = arith.constant 0 : index
    %c0_7 = arith.constant 0 : index
    %10 = vector.load %arg4[%c0_6, %c0_7] : memref<384x896xbf16, #tpu.memory_space<vmem>>, vector<384x896xbf16>
    %cst_8 = arith.constant dense<0.000000e+00> : vector<32x896xf32>
    %11 = tpu.matmul %9, %10, %cst_8 {dimension_numbers = #tpu.dot_dimension_numbers<[1], [0], [0], [1], [0, 0, 1, 1], [], []>} : vector<32x384xbf16>, vector<384x896xbf16>, vector<32x896xf32> -> vector<32x896xf32>
    %c0_9 = arith.constant 0 : index
    %c0_10 = arith.constant 0 : index
    %12 = vector.load %arg5[%c0_9, %c0_10] : memref<1x896xf32, #tpu.memory_space<vmem>>, vector<1x896xf32>
    %13 = vector.broadcast %12 : vector<1x896xf32> to vector<32x896xf32>
    %14 = arith.addf %11, %13 : vector<32x896xf32>
    %c0_11 = arith.constant 0 : index
    %c0_12 = arith.constant 0 : index
    %15 = vector.load %arg6[%c0_11, %c0_12] : memref<32x896xf32, #tpu.memory_space<vmem>>, vector<32x896xf32>
    tpu.vector_store %arg6[%c0_11, %c0_12], %14 {strides = array<i32>} : memref<32x896xf32, #tpu.memory_space<vmem>>, vector<32x896xf32>,
    return
  }
  func.func @transform_0(%arg0: i32) -> (i32, i32) {
    %c0_i32 = arith.constant 0 : i32
    %c0_i32_0 = arith.constant 0 : i32
    return %arg0, %c0_i32 : i32, i32
  }
  func.func @transform_1(%arg0: i32) -> (i32, i32) {
    %c0_i32 = arith.constant 0 : i32
    %c0_i32_0 = arith.constant 0 : i32
    %c0_i32_1 = arith.constant 0 : i32
    return %c0_i32, %c0_i32_0 : i32, i32
  }
  func.func @transform_2(%arg0: i32) -> (i32, i32) {
    %c0_i32 = arith.constant 0 : i32
    %c0_i32_0 = arith.constant 0 : i32
    %c0_i32_1 = arith.constant 0 : i32
    return %c0_i32, %c0_i32_0 : i32, i32
  }
  func.func @transform_3(%arg0: i32) -> (i32, i32) {
    %c0_i32 = arith.constant 0 : i32
    %c0_i32_0 = arith.constant 0 : i32
    %c0_i32_1 = arith.constant 0 : i32
    return %c0_i32, %c0_i32_0 : i32, i32
  }
  func.func @transform_4(%arg0: i32) -> (i32, i32) {
    %c0_i32 = arith.constant 0 : i32
    %c0_i32_0 = arith.constant 0 : i32
    %c0_i32_1 = arith.constant 0 : i32
    return %c0_i32, %c0_i32_0 : i32, i32
  }
  func.func @transform_5(%arg0: i32) -> (i32, i32) {
    %c0_i32 = arith.constant 0 : i32
    %c0_i32_0 = arith.constant 0 : i32
    return %arg0, %c0_i32 : i32, i32
  }
}

</mosaic_0001>

<bundles_post_ra>
// kernel: tpu_custom_call.1
= control target key start
LH: loop header
LB: loop body
LE: loop exit
PB: predicated region body
PF: predicated region fallthrough
CT: control target
= control target key end

     0   :  { %10 = vsyncpa [#allocation3], 0  ;;  %s3352_s0 = inlined_call_operand.vmem [shape: f32[64,36], index: 0, kind: input, shape index: {}]   ;;  %s3353_s1 = inlined_call_operand.vmem [shape: bf16[36,384], index: 1, kind: input, shape index: {}]   ;;  %s3354_s2 = inlined_call_operand.vmem [shape: f32[1,384], index: 2, kind: input, shape index: {}]   ;;  %s3355_s3 = inlined_call_operand.hbm [shape: bf16[384,896], index: 3, kind: input, shape index: {}]   ;;  %s3356_s4 = inlined_call_operand.vmem [shape: f32[1,896], index: 4, kind: input, shape index: {}]   ;;  %s3357_s5 = inlined_call_operand.hbm [shape: f32[64,896], index: 5, kind: output, shape index: {}]  }
   0x1   :  { %11 = vsyncpa [#allocation4], 0 }
   0x2   :  { %13 = vsyncpa [#allocation4 + $0x1], 0  ;;  %s3076_s18 = smov 0   ;;  %s3078_s19 = smov 0  }
   0x3   :  { %s3080_s20 = smov 0   ;;  %s3082_s21 = smov 0  }
   0x4 LB: > { %s3097_s22 = sadd.s32 4294967295, %s3039_s21   ;;  %s1990_s23 = sadd.s32 4294967294, %s3039_s21   ;;  %s3039_s21 = sphi %s3082_s21, %s3363_s21   ;;  %s3035_s20 = sphi %s3080_s20, %s3362_s20   ;;  %s3031_s19 = sphi %s3078_s19, %s3361_s19   ;;  %s3027_s18 = sphi %s3076_s18, %s3360_s18  }
   0x5   : > { %s3101_s24 = sadd.s32 1, %s3039_s21   ;;  %s136_s25 = sadd.s32 1, %s3035_s20 }
   0x6   : > { %s133_s26 = ssub.s32 %s3039_s21, %s3101_s24  ;;  %p146_p0 = scmp.ne.s32.totalorder %s3035_s20, %s3031_s19 }
   0x7   : > { %p134_p1 = scmp.eq.s32.totalorder %s133_s26, 0  ;;  %p147_p2 = scmp.eq.s32.totalorder %s3097_s22, 1 }
   0x8   : > { %p152_p3 = scmp.ne.s32.totalorder %s3031_s19, %s3027_s18  ;;  %p153_p4 = scmp.eq.s32.totalorder %s1990_s23, 1 }
   0x9   : > { %s3112_s27 = scalar_select %p134_p1, %s3035_s20, %s136_s25  }
   0xa   : > { %p3114_p5 = por %p147_p2, %p146_p0  ;;  %p3118_p6 = por %p153_p4, %p152_p3 }
   0xb   : > { %p1991_p7 = scmp.ge.s32.totalorder %s3039_s21, 1  ;;  %p160_p8 = scmp.lt.s32.totalorder %s3039_s21, 3 }
   0xc   : > { %p2903_p9 = scmp.eq.s32.totalorder %s3097_s22, 0  ;;  %s177_s7 = sshll.u32 %s3355_s3, 4  ;;  %s178_s7 = int_to_ptr.hbm [resolvable:$true] %s177_s7 }
   0xd   : > { %p161_p10 = pnand %p1991_p7, %p160_p8  ;;  %s3041_s8 = smov [#allocation2]  }
   0xe   : > { %s179_s9 = sshll.u32 %s3041_s8, 4  ;;  %s3042_s10 = smov 448   ;;  %s180_s9 = int_to_ptr.vmem [resolvable:$true] %s179_s9 }
   0xf   : > { %p2895_p11 = pneg %p161_p10  ;;  %s3043_s11 = smov 28  }
  0x10   : > { %207 = sbr.rel (%p161_p10) target bundleno = 485 (0x1e5), region = 40 }
  0x11   : > { %p2896_p12 = pnand %p2903_p9, %p2895_p11 }
  0x13   : > { %2898 = dma.hbm_to_vmem [thread:$0]  (!%p2896_p12), %s178_s7, 21504, %s180_s9, [#allocation3], %s3042_s10, %s3042_s10, %s3043_s11  }
  0x15   : > { %3018 = dma.done.wait (%p2903_p9), [#allocation3], 21504  }
  0x16   : > { %3020 = vsyncadd (%p2903_p9), [#allocation3], 4294945792  ;;  %s1996_s12 = sshll.u32 %s3097_s22, 2  ;;  %v258_v0 = vld [vmem:[%s3353_s1 + $0x30] sm:$0x33]  ;;  %vm315_vm0 = vcmask 1041408  }
  0x17   : > { %p237_p13 = scmp.lt.s32.totalorder %s1996_s12, 7  ;;  %v259_v1 = vld [vmem:[%s3353_s1 + $0x38] sm:$0x3]  ;;  %v290_v2 = vunpack.c.l.b16 %v258_v0  ;;  %v291_v3 = vunpack.c.h.b16 %v258_v0  ;;  %v2709_v9 = vld [vmem:[%s3353_s1 + $0x20] sm:$0xf0]  ;;  %vm308_vm1 = vcmask 293888  }
  0x18   : > { %v292_v4 = vunpack.c.l.b16 %v259_v1  ;;  %v2012_v5 = vld [vmem:[%s3353_s1 + $0x18] sm:$0xf]  ;;  %v2708_v10 = vld [vmem:[%s3353_s1 + $0x1c] sm:$0xf]  ;;  %v2014_v11 = vld [vmem:[%s3353_s1 + $0x24] sm:$0xf0] }
  0x19   : > { %s3365_s12 = smov (!%p237_p13, %s1996_s12), 7  ;;  %v299_v6 = vpack.c.b16 %v290_v2, %v290_v2  ;;  %v300_v7 = vpack.c.b16 %v291_v3, %v291_v3  ;;  %v2020_v12 = vld [vmem:[%s3353_s1 + $0x20] sm:$0xf]  ;;  %v2710_v13 = vld [vmem:[%s3353_s1 + $0x28] sm:$0xf0]  ;;  %v2013_v20 = vor.u32 %v2709_v9, %v2012_v5  ;;  %v2017_v21 = vor.u32 %v2708_v10, %v2014_v11  ;;  %s233_s17 = sand.u32 1, %s3031_s19  }
  0x1a   : > { %s1997_s25 = sshll.u32 %s3365_s12, 3  ;;  %v301_v8 = vpack.c.b16 %v292_v4, %v292_v4  ;;  %v2000_v17 = vld [vmem:[%s3353_s1] sm:$0xf]  ;;  %v2706_v18 = vld [vmem:[%s3353_s1 + $0x8] sm:$0xf0]  ;;  %v2021_v25 = vor.u32 %v2710_v13, %v2020_v12  ;;  %s2887_s23 = smul.u32 224, %s233_s17 }
  0x1b   : > { %v317_v14 = vsel %vm315_vm0, %v299_v6, 0  ;;  %v320_v15 = vsel %vm315_vm0, %v300_v7, 0  ;;  %v2705_v19 = vld [vmem:[%s3353_s1 + $0x4] sm:$0xf]  ;;  %v2002_v22 = vld [vmem:[%s3353_s1 + $0xc] sm:$0xf0]  ;;  %s3177_s9 = scalar_lea.vmem %s3352_s0, %s1997_s25  ;;  %v2001_v37 = vor.u32 %v2706_v18, %v2000_v17 }
  0x1c   : > { %v323_v16 = vsel %vm315_vm0, %v301_v8, 0  ;;  %330 = vmatpush.bf16.msra.mxu0 %v317_v14  ;;  %349 = vmatpush.bf16.msra.mxu1 %v320_v15  ;;  %v2226_v23 = vld [vmem:[#allocation2 + $0x188] sm:$0xf]  ;;  %v2763_v24 = vld [vmem:[#allocation2 + $0x1a0] sm:$0xf0]  ;;  %v2005_v38 = vor.u32 %v2705_v19, %v2002_v22  ;;  %v246_v13 = vld [vmem:[%s3177_s9 + $0x10] sm:$0xff] }
  0x1d   : > { %368 = vmatpush.bf16.msra.mxu2 %v323_v16  ;;  %v2008_v26 = vld [vmem:[%s3353_s1 + $0x8] sm:$0xf]  ;;  %v2707_v27 = vld [vmem:[%s3353_s1 + $0x10] sm:$0xf0]  ;;  %v2227_v28 = vor.u32 %v2763_v24, %v2226_v23  ;;  %v2819_v30 = vld [vmem:[#allocation2 + $0x360] sm:$0xf0] }
  0x1e   : > { %v2450_v29 = vld [vmem:[#allocation2 + $0x348] sm:$0xf]  ;;  %v2198_v31 = vld [vmem:[#allocation2 + $0x150] sm:$0xf]  ;;  %v2756_v32 = vld [vmem:[#allocation2 + $0x168] sm:$0xf0]  ;;  %v2009_v42 = vor.u32 %v2707_v27, %v2008_v26 }
  0x1f   : > { %v244_v33 = vld [vmem:[%s3177_s9] sm:$0xff]  ;;  %1472 = vmatpush.bf16.msra.mxu3 %v2227_v28  ;;  %v2760_v34 = vld [vmem:[#allocation2 + $0x18c] sm:$0xf]  ;;  %v2228_v35 = vld [vmem:[#allocation2 + $0x1a4] sm:$0xf0]  ;;  %v2199_v36 = vor.u32 %v2756_v32, %v2198_v31  ;;  %v2451_v43 = vor.u32 %v2819_v30, %v2450_v29  ;;  %s3276_s26 = scalar_lea.vmem [#allocation5], %s2887_s23 }
  0x20   : > { %331 = vmatpush.bf16.msra.mxu0 %v2013_v20  ;;  %350 = vmatpush.bf16.msra.mxu1 %v2017_v21  ;;  %v245_v39 = vld [vmem:[%s3177_s9 + $0x8] sm:$0xff]  ;;  %v2875_v41 = vld [vmem:[#allocation2 + $0x520] sm:$0xf0]  ;;  %v2170_v44 = vld [vmem:[#allocation2 + $0x118] sm:$0xf]  ;;  %v2231_v46 = vor.u32 %v2760_v34, %v2228_v35  ;;  %s2888_s30 = smul.u32 224, %s3097_s22 }
  0x21   : > { %v2674_v40 = vld [vmem:[#allocation2 + $0x508] sm:$0xf]  ;;  %369 = vmatpush.bf16.msra.mxu2 %v2021_v25  ;;  %v2749_v45 = vld [vmem:[#allocation2 + $0x130] sm:$0xf0]  ;;  %v2422_v47 = vld [vmem:[#allocation2 + $0x310] sm:$0xf]  ;;  %v248_v51 = vpack.c.bf16 %v245_v39, %v244_v33 }
  0x22   : > { %v2812_v48 = vld [vmem:[#allocation2 + $0x328] sm:$0xf0]  ;;  %v2753_v49 = vld [vmem:[#allocation2 + $0x154] sm:$0xf]  ;;  %v2675_v50 = vor.u32 %v2875_v41, %v2674_v40  ;;  %v2200_v52 = vld [vmem:[#allocation2 + $0x16c] sm:$0xf0]  ;;  %v2171_v55 = vor.u32 %v2749_v45, %v2170_v44  ;;  %s1912_s8 = scalar_lea.hbm %s3357_s5, %s2888_s30 }
  0x23   : > { %1473 = vmatpush.bf16.msra.mxu3 %v2199_v36  ;;  %v2646_v53 = vld [vmem:[#allocation2 + $0x4d0] sm:$0xf]  ;;  %v2868_v54 = vld [vmem:[#allocation2 + $0x4e8] sm:$0xf0]  ;;  %v2423_v56 = vor.u32 %v2812_v48, %v2422_v47  ;;  %v2142_v57 = vld [vmem:[#allocation2 + $0xe0] sm:$0xf]  ;;  %v2203_v59 = vor.u32 %v2753_v49, %v2200_v52 }
  0x24   : > { %332 = vmatpush.bf16.msra.mxu0 %v2001_v37  ;;  %351 = vmatpush.bf16.msra.mxu1 %v2005_v38  ;;  %v2742_v58 = vld [vmem:[#allocation2 + $0xf8] sm:$0xf0]  ;;  %v2394_v60 = vld [vmem:[#allocation2 + $0x2d8] sm:$0xf]  ;;  %v2805_v61 = vld [vmem:[#allocation2 + $0x2f0] sm:$0xf0]  ;;  %v2647_v63 = vor.u32 %v2868_v54, %v2646_v53 }
  0x25   : > { %370 = vmatpush.bf16.msra.mxu2 %v2009_v42  ;;  %v2746_v62 = vld [vmem:[#allocation2 + $0x11c] sm:$0xf]  ;;  %v2172_v0 = vld [vmem:[#allocation2 + $0x134] sm:$0xf0]  ;;  %v2861_v2 = vld [vmem:[#allocation2 + $0x4b0] sm:$0xf0]  ;;  %v2143_v3 = vor.u32 %v2742_v58, %v2142_v57  ;;  %v2395_v4 = vor.u32 %v2805_v61, %v2394_v60 }
  0x26   : > { %v2618_v1 = vld [vmem:[#allocation2 + $0x498] sm:$0xf]  ;;  %v2175_v5 = vor.u32 %v2746_v62, %v2172_v0  ;;  %v2366_v6 = vld [vmem:[#allocation2 + $0x2a0] sm:$0xf]  ;;  %v2798_v7 = vld [vmem:[#allocation2 + $0x2b8] sm:$0xf0] }
  0x27   : > { %2022 = vmatmul.msk.bf16.vlgmr.msra.gmra.mxu0 %vm308_vm1, %v248_v51  ;;  %2024 = vmatmul.msk.bf16.vlgmr.msra.gmra.mxu1 %vm308_vm1, %v248_v51  ;;  %v2619_v8 = vor.u32 %v2861_v2, %v2618_v1  ;;  %v2739_v9 = vld [vmem:[#allocation2 + $0xe4] sm:$0xf]  ;;  %v2144_v10 = vld [vmem:[#allocation2 + $0xfc] sm:$0xf0]  ;;  %v2367_v11 = vor.u32 %v2798_v7, %v2366_v6  ;;  %v247_v14 = vld [vmem:[%s3177_s9 + $0x18] sm:$0xff]  ;;  %s1913_s9 = sshll.u32 %s3276_s26, 4  ;;  %s1914_s9 = int_to_ptr.vmem [resolvable:$true] %s1913_s9 }
  0x28   : > { %1491 = vmatpush.bf16.msrb.mxu0 %v2451_v43  ;;  %1510 = vmatpush.bf16.msrb.mxu1 %v2675_v50  ;;  %v2147_v12 = vor.u32 %v2739_v9, %v2144_v10  ;;  %v249_v15 = vpack.c.bf16 %v247_v14, %v246_v13  ;;  %v2114_v16 = vld [vmem:[#allocation2 + $0xa8] sm:$0xf]  ;;  %v2735_v17 = vld [vmem:[#allocation2 + $0xc0] sm:$0xf0]  ;;  %v2732_v21 = vld [vmem:[#allocation2 + $0xac] sm:$0xf] }
  0x29   : > { %1529 = vmatpush.bf16.msrb.mxu2 %v2231_v46  ;;  %1474 = vmatpush.bf16.msra.mxu3 %v2171_v55  ;;  %v2338_v18 = vld [vmem:[#allocation2 + $0x268] sm:$0xf]  ;;  %v2115_v19 = vor.u32 %v2735_v17, %v2114_v16  ;;  %v2791_v20 = vld [vmem:[#allocation2 + $0x280] sm:$0xf0]  ;;  %v2590_v25 = vld [vmem:[#allocation2 + $0x460] sm:$0xf] }
  0x2a   : > { %2026 = vmatmul.msk.bf16.vlgmr.msra.gmra.mxu2 %vm308_vm1, %v248_v51  ;;  %v2116_v22 = vld [vmem:[#allocation2 + $0xc4] sm:$0xf0]  ;;  %v2339_v23 = vor.u32 %v2791_v20, %v2338_v18  ;;  %v2854_v26 = vld [vmem:[#allocation2 + $0x478] sm:$0xf0]  ;;  %v2086_v28 = vld [vmem:[#allocation2 + $0x70] sm:$0xf] }
  0x2b   : > { %v2119_v24 = vor.u32 %v2732_v21, %v2116_v22  ;;  %v2591_v27 = vor.u32 %v2854_v26, %v2590_v25  ;;  %v2728_v29 = vld [vmem:[#allocation2 + $0x88] sm:$0xf0]  ;;  %v2310_v30 = vld [vmem:[#allocation2 + $0x230] sm:$0xf]  ;;  %v2725_v33 = vld [vmem:[#allocation2 + $0x74] sm:$0xf] }
  0x2c   : > { %1492 = vmatpush.bf16.msrb.mxu0 %v2423_v56  ;;  %1511 = vmatpush.bf16.msrb.mxu1 %v2647_v63  ;;  %v2087_v31 = vor.u32 %v2728_v29, %v2086_v28  ;;  %v2784_v32 = vld [vmem:[#allocation2 + $0x248] sm:$0xf0]  ;;  %v2088_v35 = vld [vmem:[#allocation2 + $0x8c] sm:$0xf0]  ;;  %v2562_v36 = vld [vmem:[#allocation2 + $0x428] sm:$0xf] }
  0x2d   : > { %1530 = vmatpush.bf16.msrb.mxu2 %v2203_v59  ;;  %1475 = vmatpush.bf16.msra.mxu3 %v2143_v3  ;;  %v2311_v34 = vor.u32 %v2784_v32, %v2310_v30  ;;  %v2847_v37 = vld [vmem:[#allocation2 + $0x440] sm:$0xf0]  ;;  %v2091_v38 = vor.u32 %v2725_v33, %v2088_v35  ;;  %v2058_v40 = vld [vmem:[#allocation2 + $0x38] sm:$0xf]  ;;  %v2721_v41 = vld [vmem:[#allocation2 + $0x50] sm:$0xf0] }
  0x2e   : > { %v2563_v39 = vor.u32 %v2847_v37, %v2562_v36  ;;  %v2282_v42 = vld [vmem:[#allocation2 + $0x1f8] sm:$0xf]  ;;  %v2059_v43 = vor.u32 %v2721_v41, %v2058_v40  ;;  %v2777_v44 = vld [vmem:[#allocation2 + $0x210] sm:$0xf0]  ;;  %v2718_v45 = vld [vmem:[#allocation2 + $0x3c] sm:$0xf] }
  0x2f   : > { %v2060_v46 = vld [vmem:[#allocation2 + $0x54] sm:$0xf0]  ;;  %v2283_v47 = vor.u32 %v2777_v44, %v2282_v42  ;;  %v2534_v49 = vld [vmem:[#allocation2 + $0x3f0] sm:$0xf]  ;;  %v2840_v50 = vld [vmem:[#allocation2 + $0x408] sm:$0xf0] }
  0x30   : > { %1493 = vmatpush.bf16.msrb.mxu0 %v2395_v4  ;;  %1512 = vmatpush.bf16.msrb.mxu1 %v2619_v8  ;;  %v2063_v48 = vor.u32 %v2718_v45, %v2060_v46  ;;  %v2535_v51 = vor.u32 %v2840_v50, %v2534_v49  ;;  %v2030_v52 = vld [vmem:[#allocation2] sm:$0xf]  ;;  %v2714_v53 = vld [vmem:[#allocation2 + $0x18] sm:$0xf0]  ;;  %v2711_v57 = vld [vmem:[#allocation2 + $0x4] sm:$0xf] }
  0x31   : > { %1531 = vmatpush.bf16.msrb.mxu2 %v2175_v5  ;;  %1476 = vmatpush.bf16.msra.mxu3 %v2115_v19  ;;  %v2254_v54 = vld [vmem:[#allocation2 + $0x1c0] sm:$0xf]  ;;  %v2031_v55 = vor.u32 %v2714_v53, %v2030_v52  ;;  %v2770_v56 = vld [vmem:[#allocation2 + $0x1d8] sm:$0xf0]  ;;  %v2506_v61 = vld [vmem:[#allocation2 + $0x3b8] sm:$0xf] }
  0x32   : > { %v2032_v58 = vld [vmem:[#allocation2 + $0x1c] sm:$0xf0]  ;;  %v2255_v59 = vor.u32 %v2770_v56, %v2254_v54  ;;  %v2833_v62 = vld [vmem:[#allocation2 + $0x3d0] sm:$0xf0]  ;;  %v2816_v0 = vld [vmem:[#allocation2 + $0x34c] sm:$0xf] }
  0x33   : > { %v2035_v60 = vor.u32 %v2711_v57, %v2032_v58  ;;  %v2507_v63 = vor.u32 %v2833_v62, %v2506_v61  ;;  %v2452_v1 = vld [vmem:[#allocation2 + $0x364] sm:$0xf0]  ;;  %v2872_v2 = vld [vmem:[#allocation2 + $0x50c] sm:$0xf]  ;;  %v2458_v5 = vld [vmem:[#allocation2 + $0x350] sm:$0xf] }
  0x34   : > { %1494 = vmatpush.bf16.msrb.mxu0 %v2367_v11  ;;  %1513 = vmatpush.bf16.msrb.mxu1 %v2591_v27  ;;  %v2455_v3 = vor.u32 %v2816_v0, %v2452_v1  ;;  %v2676_v4 = vld [vmem:[#allocation2 + $0x524] sm:$0xf0]  ;;  %v2820_v6 = vld [vmem:[#allocation2 + $0x368] sm:$0xf0]  ;;  %v2478_v9 = vld [vmem:[#allocation2 + $0x380] sm:$0xf] }
  0x35   : > { %1532 = vmatpush.bf16.msrb.mxu2 %v2147_v12  ;;  %1477 = vmatpush.bf16.msra.mxu3 %v2087_v31  ;;  %v2679_v7 = vor.u32 %v2872_v2, %v2676_v4  ;;  %v2459_v8 = vor.u32 %v2820_v6, %v2458_v5  ;;  %v2826_v10 = vld [vmem:[#allocation2 + $0x398] sm:$0xf0]  ;;  %v2809_v12 = vld [vmem:[#allocation2 + $0x314] sm:$0xf]  ;;  %v2424_v13 = vld [vmem:[#allocation2 + $0x32c] sm:$0xf0] }
  0x36   : > { %v2479_v11 = vor.u32 %v2826_v10, %v2478_v9  ;;  %v2865_v14 = vld [vmem:[#allocation2 + $0x4d4] sm:$0xf]  ;;  %v2648_v16 = vld [vmem:[#allocation2 + $0x4ec] sm:$0xf0]  ;;  %v2430_v17 = vld [vmem:[#allocation2 + $0x318] sm:$0xf] }
  0x37   : > { %2023 = vmatmul.msk.bf16.gmra.mxu0 %vm308_vm1, %v249_v15  ;;  %2025 = vmatmul.msk.bf16.gmra.mxu1 %vm308_vm1, %v249_v15  ;;  %v2813_v18 = vld [vmem:[#allocation2 + $0x330] sm:$0xf0]  ;;  %v2651_v19 = vor.u32 %v2865_v14, %v2648_v16  ;;  %v2234_v21 = vld [vmem:[#allocation2 + $0x190] sm:$0xf]  ;;  %v2764_v22 = vld [vmem:[#allocation2 + $0x1a8] sm:$0xf0] }
  0x38   : > { %1495 = vmatpush.bf16.msrb.mxu0 %v2339_v23  ;;  %1514 = vmatpush.bf16.msrb.mxu1 %v2563_v39  ;;  %v2431_v20 = vor.u32 %v2813_v18, %v2430_v17  ;;  %v2235_v23 = vor.u32 %v2764_v22, %v2234_v21  ;;  %v2396_v25 = vld [vmem:[#allocation2 + $0x2f4] sm:$0xf0]  ;;  %v2858_v26 = vld [vmem:[#allocation2 + $0x49c] sm:$0xf]  ;;  %v2402_v29 = vld [vmem:[#allocation2 + $0x2e0] sm:$0xf] }
  0x39   : > { %1533 = vmatpush.bf16.msrb.mxu2 %v2119_v24  ;;  %1478 = vmatpush.bf16.msra.mxu3 %v2059_v43  ;;  %v2802_v24 = vld [vmem:[#allocation2 + $0x2dc] sm:$0xf]  ;;  %v2620_v28 = vld [vmem:[#allocation2 + $0x4b4] sm:$0xf0]  ;;  %v2795_v36 = vld [vmem:[#allocation2 + $0x2a4] sm:$0xf] }
  0x3a   : > { %2027 = vmatmul.msk.bf16.gmra.mxu2 %vm308_vm1, %v249_v15  ;;  %v2427_v15 = vor.u32 %v2809_v12, %v2424_v13  ;;  %v2399_v27 = vor.u32 %v2802_v24, %v2396_v25  ;;  %v2806_v30 = vld [vmem:[#allocation2 + $0x2f8] sm:$0xf0]  ;;  %v2623_v31 = vor.u32 %v2858_v26, %v2620_v28  ;;  %v2206_v33 = vld [vmem:[#allocation2 + $0x158] sm:$0xf]  ;;  %v2368_v37 = vld [vmem:[#allocation2 + $0x2bc] sm:$0xf0] }
  0x3b   : > { %v2403_v32 = vor.u32 %v2806_v30, %v2402_v29  ;;  %v2371_v39 = vor.u32 %v2795_v36, %v2368_v37  ;;  %v2592_v40 = vld [vmem:[#allocation2 + $0x47c] sm:$0xf0]  ;;  %v2374_v41 = vld [vmem:[#allocation2 + $0x2a8] sm:$0xf]  ;;  %v2799_v42 = vld [vmem:[#allocation2 + $0x2c0] sm:$0xf0] }
  0x3c   : > { %1496 = vmatpush.bf16.msrb.mxu0 %v2311_v34  ;;  %1515 = vmatpush.bf16.msrb.mxu1 %v2535_v51  ;;  %v2757_v34 = vld [vmem:[#allocation2 + $0x170] sm:$0xf0]  ;;  %v2375_v44 = vor.u32 %v2799_v42, %v2374_v41  ;;  %v2178_v45 = vld [vmem:[#allocation2 + $0x120] sm:$0xf]  ;;  %v2750_v46 = vld [vmem:[#allocation2 + $0x138] sm:$0xf0] }
  0x3d   : > { %1534 = vmatpush.bf16.msrb.mxu2 %v2091_v38  ;;  %1479 = vmatpush.bf16.msra.mxu3 %v2031_v55  ;;  %v2207_v35 = vor.u32 %v2757_v34, %v2206_v33  ;;  %v2851_v38 = vld [vmem:[#allocation2 + $0x464] sm:$0xf]  ;;  %v2788_v49 = vld [vmem:[#allocation2 + $0x26c] sm:$0xf]  ;;  %v2340_v50 = vld [vmem:[#allocation2 + $0x284] sm:$0xf0] }
  0x3e   : > { %v2595_v43 = vor.u32 %v2851_v38, %v2592_v40  ;;  %v2844_v51 = vld [vmem:[#allocation2 + $0x42c] sm:$0xf]  ;;  %v2343_v52 = vor.u32 %v2788_v49, %v2340_v50  ;;  %v2564_v53 = vld [vmem:[#allocation2 + $0x444] sm:$0xf0]  ;;  %v2346_v54 = vld [vmem:[#allocation2 + $0x270] sm:$0xf] }
  0x3f   : > { %v2792_v55 = vld [vmem:[#allocation2 + $0x288] sm:$0xf0]  ;;  %v2567_v58 = vor.u32 %v2844_v51, %v2564_v53  ;;  %v2743_v61 = vld [vmem:[#allocation2 + $0x100] sm:$0xf0]  ;;  %v2781_v1 = vld [vmem:[#allocation2 + $0x234] sm:$0xf] }
  0x40   : > { %1497 = vmatpush.bf16.msrb.mxu0 %v2283_v47  ;;  %1516 = vmatpush.bf16.msrb.mxu1 %v2507_v63  ;;  %v260_v47 = vld [vmem:[%s3354_s2] sm:$0x7]  ;;  %v2312_v2 = vld [vmem:[#allocation2 + $0x24c] sm:$0xf0]  ;;  %v2318_v6 = vld [vmem:[#allocation2 + $0x238] sm:$0xf] }
  0x41   : > { %1535 = vmatpush.bf16.msrb.mxu2 %v2063_v48  ;;  %1548 = vmatpush.bf16.msrb.mxu3 %v2455_v3  ;;  %v2179_v48 = vor.u32 %v2750_v46, %v2178_v45  ;;  %v3198_v62 = vperm.slane %v260_v47, 0  ;;  %v3200_v63 = vperm.slane %v260_v47, 1  ;;  %v2837_v3 = vld [vmem:[#allocation2 + $0x3f4] sm:$0xf]  ;;  %v2315_v4 = vor.u32 %v2781_v1, %v2312_v2  ;;  %v2536_v5 = vld [vmem:[#allocation2 + $0x40c] sm:$0xf0] }
  0x42   : > { %v2122_v9 = vld [vmem:[#allocation2 + $0xb0] sm:$0xf]  ;;  %v2736_v10 = vld [vmem:[#allocation2 + $0xc8] sm:$0xf0]  ;;  %v2774_v16 = vld [vmem:[#allocation2 + $0x1fc] sm:$0xf] }
  0x43   : > { %v2123_v13 = vor.u32 %v2736_v10, %v2122_v9  ;;  %v2284_v17 = vld [vmem:[#allocation2 + $0x214] sm:$0xf0]  ;;  %v2830_v18 = vld [vmem:[#allocation2 + $0x3bc] sm:$0xf]  ;;  %v2290_v22 = vld [vmem:[#allocation2 + $0x200] sm:$0xf] }
  0x44   : > { %1498 = vmatpush.bf16.msrb.mxu0 %v2255_v59  ;;  %1517 = vmatpush.bf16.msrb.mxu1 %v2479_v11  ;;  %v2347_v59 = vor.u32 %v2792_v55, %v2346_v54  ;;  %v3202_v11 = vperm.slane %v260_v47, 2  ;;  %v2508_v21 = vld [vmem:[#allocation2 + $0x3d4] sm:$0xf0]  ;;  %v2729_v29 = vld [vmem:[#allocation2 + $0x90] sm:$0xf0]  ;;  %s1915_s10 = sshll.u32 %s1912_s8, 4  ;;  %s1916_s10 = int_to_ptr.hbm [resolvable:$true] %s1915_s10 }
  0x45   : > { %1536 = vmatpush.bf16.msrb.mxu2 %v2035_v60  ;;  %1549 = vmatpush.bf16.msrb.mxu3 %v2427_v15  ;;  %v2150_v60 = vld [vmem:[#allocation2 + $0xe8] sm:$0xf]  ;;  %v2511_v26 = vor.u32 %v2830_v18, %v2508_v21  ;;  %v2094_v28 = vld [vmem:[#allocation2 + $0x78] sm:$0xf]  ;;  %v2767_v30 = vld [vmem:[#allocation2 + $0x1c4] sm:$0xf] }
  0x46   : > { %v2151_v0 = vor.u32 %v2743_v61, %v2150_v60  ;;  %v2095_v34 = vor.u32 %v2729_v29, %v2094_v28  ;;  %v2823_v36 = vld [vmem:[#allocation2 + $0x384] sm:$0xf]  ;;  %v2480_v37 = vld [vmem:[#allocation2 + $0x39c] sm:$0xf0]  ;;  %v2262_v42 = vld [vmem:[#allocation2 + $0x1c8] sm:$0xf] }
  0x47   : > { %v2483_v41 = vor.u32 %v2823_v36, %v2480_v37  ;;  %v2066_v46 = vld [vmem:[#allocation2 + $0x40] sm:$0xf]  ;;  %v2722_v47 = vld [vmem:[#allocation2 + $0x58] sm:$0xf0]  ;;  %v2682_v53 = vld [vmem:[#allocation2 + $0x510] sm:$0xf] }
  0x48   : > { %1567 = vmatpush.bf16.msra.mxu0 %v2679_v7  ;;  %1586 = vmatpush.bf16.msra.mxu1 %v2235_v23  ;;  %v2539_v7 = vor.u32 %v2837_v3, %v2536_v5  ;;  %v2778_v23 = vld [vmem:[#allocation2 + $0x218] sm:$0xf0]  ;;  %v2876_v54 = vld [vmem:[#allocation2 + $0x528] sm:$0xf0]  ;;  %v2761_v55 = vld [vmem:[#allocation2 + $0x194] sm:$0xf] }
  0x49   : > { %1605 = vmatpush.bf16.msra.mxu2 %v2459_v8  ;;  %1550 = vmatpush.bf16.msrb.mxu3 %v2399_v27  ;;  %v2785_v8 = vld [vmem:[#allocation2 + $0x250] sm:$0xf0]  ;;  %v2291_v27 = vor.u32 %v2778_v23, %v2290_v22  ;;  %v2684_v60 = vld [vmem:[#allocation2 + $0x52c] sm:$0xf0]  ;;  %v2715_v5 = vld [vmem:[#allocation2 + $0x20] sm:$0xf0] }
  0x4a   : > { %v2319_v12 = vor.u32 %v2785_v8, %v2318_v6  ;;  %v2654_v6 = vld [vmem:[#allocation2 + $0x4d8] sm:$0xf]  ;;  %v2869_v8 = vld [vmem:[#allocation2 + $0x4f0] sm:$0xf0]  ;;  %v2754_v9 = vld [vmem:[#allocation2 + $0x15c] sm:$0xf] }
  0x4b   : > { %v2208_v10 = vld [vmem:[#allocation2 + $0x174] sm:$0xf0]  ;;  %v2180_v29 = vld [vmem:[#allocation2 + $0x13c] sm:$0xf0]  ;;  %v2810_v36 = vld [vmem:[#allocation2 + $0x31c] sm:$0xf] }
  0x4c   : > { %1568 = vmatpush.bf16.msra.mxu0 %v2651_v19  ;;  %1587 = vmatpush.bf16.msra.mxu1 %v2207_v35  ;;  %v2256_v35 = vld [vmem:[#allocation2 + $0x1dc] sm:$0xf0]  ;;  %v2432_v37 = vld [vmem:[#allocation2 + $0x334] sm:$0xf0]  ;;  %s1900_s22 = scalar_lea.sflag [#allocation4], %s233_s17  ;;  %s2987_s11 = sshra.s32 %s1916_s10, 4  ;;  %s2988_s11 = int_to_ptr.hbm [resolvable:$true] %s2987_s11 }
  0x4d   : > { %1606 = vmatpush.bf16.msra.mxu2 %v2431_v20  ;;  %1551 = vmatpush.bf16.msrb.mxu3 %v2371_v39  ;;  %v2287_v20 = vor.u32 %v2774_v16, %v2284_v17  ;;  %v2259_v40 = vor.u32 %v2767_v30, %v2256_v35  ;;  %v2656_v16 = vld [vmem:[#allocation2 + $0x4f4] sm:$0xf0]  ;;  %v2859_v30 = vld [vmem:[#allocation2 + $0x4a4] sm:$0xf]  ;;  %s2989_s12 = scalar_lea.hbm %s2988_s11, 224  ;;  %s2993_s14 = scalar_lea.hbm %s3357_s5, 448 }
  0x4e   : > { %p2990_p0 = scmp.ne.s32.totalorder %s2988_s11, %s2989_s12  ;;  %p2994_p3 = scmp.lt.s32.totalorder %s2988_s11, %s3357_s5 }
  0x4f   : > { %p2995_p4 = scmp.lt.s32.totalorder %s2993_s14, %s2989_s12 }
  0x50   : > { %1569 = vmatpush.bf16.msra.mxu0 %v2623_v31  ;;  %1588 = vmatpush.bf16.msra.mxu1 %v2179_v48  ;;  %v2067_v48 = vor.u32 %v2722_v47, %v2066_v46  ;;  %p2991_p1 = pnand %p2990_p0, %p3114_p5 }
  0x51   : > { %1607 = vmatpush.bf16.msra.mxu2 %v2403_v32  ;;  %1552 = vmatpush.bf16.msrb.mxu3 %v2343_v52  ;;  %p2996_p7 = por %p2995_p4, %p2994_p3 }
  0x52   : > { %p2992_p2 = pneg %p2991_p1 }
  0x54   : > { %1570 = vmatpush.bf16.msra.mxu0 %v2595_v43  ;;  %1589 = vmatpush.bf16.msra.mxu1 %v2151_v0  ;;  %v2771_v43 = vld [vmem:[#allocation2 + $0x1e0] sm:$0xf0]  ;;  %p2997_p8 = pnand %p2996_p7, %p2992_p2 }
  0x55   : > { %1608 = vmatpush.bf16.msra.mxu2 %v2375_v44  ;;  %1553 = vmatpush.bf16.msrb.mxu3 %v2315_v4  ;;  %v2263_v52 = vor.u32 %v2771_v43, %v2262_v42  ;;  %v2038_v4 = vld [vmem:[#allocation2 + $0x8] sm:$0xf]  ;;  %v2435_v42 = vor.u32 %v2810_v36, %v2432_v37  ;;  %v2855_v43 = vld [vmem:[#allocation2 + $0x480] sm:$0xf0]  ;;  %v2782_v36 = vld [vmem:[#allocation2 + $0x23c] sm:$0xf] }
  0x56   : > { %v2320_v37 = vld [vmem:[#allocation2 + $0x254] sm:$0xf0] }
  0x58   : > { %1571 = vmatpush.bf16.msra.mxu0 %v2567_v58  ;;  %1590 = vmatpush.bf16.msra.mxu1 %v2123_v13  ;;  %v2236_v58 = vld [vmem:[#allocation2 + $0x1ac] sm:$0xf0]  ;;  %v2655_v13 = vor.u32 %v2869_v8, %v2654_v6 }
  0x59   : > { %1609 = vmatpush.bf16.msra.mxu2 %v2347_v59  ;;  %1554 = vmatpush.bf16.msrb.mxu3 %v2287_v20  ;;  %v2873_v59 = vld [vmem:[#allocation2 + $0x514] sm:$0xf]  ;;  %v2239_v2 = vor.u32 %v2761_v55, %v2236_v58  ;;  %v2460_v20 = vld [vmem:[#allocation2 + $0x36c] sm:$0xf0] }
  0x5a   : > { %v2687_v3 = vor.u32 %v2873_v59, %v2684_v60  ;;  %v2572_v6 = vld [vmem:[#allocation2 + $0x44c] sm:$0xf0] }
  0x5c   : > { %1572 = vmatpush.bf16.msra.mxu0 %v2539_v7  ;;  %1591 = vmatpush.bf16.msra.mxu1 %v2095_v34  ;;  %v2039_v7 = vor.u32 %v2715_v5, %v2038_v4  ;;  %v2124_v4 = vld [vmem:[#allocation2 + $0xcc] sm:$0xf0]  ;;  %v2845_v5 = vld [vmem:[#allocation2 + $0x434] sm:$0xf] }
  0x5d   : > { %1610 = vmatpush.bf16.msra.mxu2 %v2319_v12  ;;  %1555 = vmatpush.bf16.msrb.mxu3 %v2259_v40 }
  0x60   : > { %1573 = vmatpush.bf16.msra.mxu0 %v2511_v26  ;;  %1592 = vmatpush.bf16.msra.mxu1 %v2067_v48  ;;  %v2747_v26 = vld [vmem:[#allocation2 + $0x124] sm:$0xf] }
  0x61   : > { %1611 = vmatpush.bf16.msra.mxu2 %v2291_v27  ;;  %v2183_v34 = vor.u32 %v2747_v26, %v2180_v29  ;;  %v2834_v29 = vld [vmem:[#allocation2 + $0x3d8] sm:$0xf0] }
  0x64   : > { %1574 = vmatpush.bf16.msra.mxu0 %v2483_v41  ;;  %1593 = vmatpush.bf16.msra.mxu1 %v2039_v7 }
  0x65   : > { %1612 = vmatpush.bf16.msra.mxu2 %v2263_v52  ;;  %v2852_v52 = vld [vmem:[#allocation2 + $0x46c] sm:$0xf] }
  0xa4   : > { %v334_v56 = vpop.f32.mrf.mxu0  ;;  %v353_v57 = vpop.f32.mrf.mxu1 }
  0xa5   : > { %v335_v14 = vadd.f32 %v334_v56, %v3198_v62  ;;  %v354_v15 = vadd.f32 %v353_v57, %v3200_v63  ;;  %v2683_v57 = vor.u32 %v2876_v54, %v2682_v53  ;;  %v2600_v53 = vld [vmem:[#allocation2 + $0x484] sm:$0xf0] }
  0xa6   : > { %v2603_v60 = vor.u32 %v2852_v52, %v2600_v53 }
  0xa7   : > { %v382_v38 = vmax.f32 %v335_v14, 0.0  ;;  %v383_v39 = vmax.f32 %v354_v15, 0.0  ;;  %v2211_v14 = vor.u32 %v2754_v9, %v2208_v10  ;;  %v2866_v15 = vld [vmem:[#allocation2 + $0x4dc] sm:$0xf]  ;;  %v2796_v9 = vld [vmem:[#allocation2 + $0x2ac] sm:$0xf] }
  0xa8   : > { %v2659_v17 = vor.u32 %v2866_v15, %v2656_v16  ;;  %v2376_v10 = vld [vmem:[#allocation2 + $0x2c4] sm:$0xf0]  ;;  %v2841_v15 = vld [vmem:[#allocation2 + $0x410] sm:$0xf0]  ;;  %v2726_v16 = vld [vmem:[#allocation2 + $0x7c] sm:$0xf] }
  0xac   : > { %v336_v24 = vpop.f32.mrf.mxu0  ;;  %v355_v25 = vpop.f32.mrf.mxu1 }
  0xad   : > { %v372_v19 = vpop.f32.mrf.mxu2  ;;  %v337_v32 = vadd.f32 %v336_v24, %v3198_v62  ;;  %v356_v33 = vadd.f32 %v355_v25, %v3200_v63  ;;  %v2626_v24 = vld [vmem:[#allocation2 + $0x4a0] sm:$0xf]  ;;  %v2862_v25 = vld [vmem:[#allocation2 + $0x4b8] sm:$0xf0] }
  0xae   : > { %v3207_v31 = vadd.f32 %v372_v19, %v3202_v11  ;;  %v2817_v19 = vld [vmem:[#allocation2 + $0x354] sm:$0xf]  ;;  %v2627_v28 = vor.u32 %v2862_v25, %v2626_v24  ;;  %v2348_v25 = vld [vmem:[#allocation2 + $0x28c] sm:$0xf0] }
  0xaf   : > { %v385_v44 = vmax.f32 %v337_v32, 0.0  ;;  %v386_v45 = vmax.f32 %v356_v33, 0.0  ;;  %v2463_v21 = vor.u32 %v2817_v19, %v2460_v20  ;;  %v2789_v24 = vld [vmem:[#allocation2 + $0x274] sm:$0xf] }
  0xb0   : > { %v384_v49 = vmax.f32 %v3207_v31, 0.0  ;;  %v2628_v31 = vld [vmem:[#allocation2 + $0x4bc] sm:$0xf0] }
  0xb1   : > { %v3212_v50 = vpack.c.bf16 %v385_v44, %v382_v38  ;;  %v3214_v51 = vpack.c.bf16 %v386_v45, %v383_v39  ;;  %v2631_v35 = vor.u32 %v2859_v30, %v2628_v31  ;;  %v2598_v38 = vld [vmem:[#allocation2 + $0x468] sm:$0xf]  ;;  %v2740_v44 = vld [vmem:[#allocation2 + $0xec] sm:$0xf]  ;;  %v2719_v30 = vld [vmem:[#allocation2 + $0x44] sm:$0xf] }
  0xb2   : > { %v2152_v45 = vld [vmem:[#allocation2 + $0x104] sm:$0xf0]  ;;  %v2599_v48 = vor.u32 %v2855_v43, %v2598_v38 }
  0xb3   : > { %1480 = vmatmul.bf16.vlgmr.msra.gmra.mxu3 %v3212_v50  ;;  %1499 = vmatmul.bf16.vlgmr.msrb.gmra.mxu0 %v3214_v51  ;;  %v2486_v38 = vld [vmem:[#allocation2 + $0x388] sm:$0xf] }
  0xb4   : > { %1537 = vmatmul.bf16.vlgmr.msrb.gmra.mxu2 %v3212_v50  ;;  %v339_v0 = vpop.f32.mrf.mxu0  ;;  %v358_v1 = vpop.f32.mrf.mxu1  ;;  %1624 = vmatpush.bf16.msra.mxu3 %v2683_v57  ;;  %v2040_v43 = vld [vmem:[#allocation2 + $0x24] sm:$0xf0] }
  0xb5   : > { %v374_v56 = vpop.f32.mrf.mxu2  ;;  %1643 = vmatpush.bf16.msrb.mxu0 %v2239_v2  ;;  %1681 = vmatpush.bf16.msrb.mxu2 %v2687_v3  ;;  %v340_v22 = vadd.f32 %v339_v0, %v3198_v62  ;;  %v359_v23 = vadd.f32 %v358_v1, %v3200_v63  ;;  %v2848_v0 = vld [vmem:[#allocation2 + $0x448] sm:$0xf0]  ;;  %v2733_v1 = vld [vmem:[#allocation2 + $0xb4] sm:$0xf] }
  0xb6   : > { %v375_v61 = vadd.f32 %v374_v56, %v3202_v11  ;;  %v2803_v56 = vld [vmem:[#allocation2 + $0x2e4] sm:$0xf]  ;;  %v2127_v8 = vor.u32 %v2733_v1, %v2124_v4  ;;  %v2768_v1 = vld [vmem:[#allocation2 + $0x1cc] sm:$0xf] }
  0xb7   : > { %v388_v46 = vmax.f32 %v340_v22, 0.0  ;;  %v389_v47 = vmax.f32 %v359_v23, 0.0  ;;  %v2838_v22 = vld [vmem:[#allocation2 + $0x3fc] sm:$0xf] }
  0xb8   : > { %v387_v12 = vmax.f32 %v375_v61, 0.0  ;;  %1625 = vmatpush.bf16.msra.mxu3 %v2655_v13  ;;  %v2570_v61 = vld [vmem:[#allocation2 + $0x430] sm:$0xf]  ;;  %v2575_v13 = vor.u32 %v2845_v5, %v2572_v6  ;;  %v2758_v5 = vld [vmem:[#allocation2 + $0x178] sm:$0xf0] }
  0xb9   : > { %1644 = vmatpush.bf16.msrb.mxu0 %v2211_v14  ;;  %1682 = vmatpush.bf16.msrb.mxu2 %v2659_v17  ;;  %v2571_v3 = vor.u32 %v2848_v0, %v2570_v61  ;;  %v2379_v14 = vor.u32 %v2796_v9, %v2376_v10  ;;  %v2096_v17 = vld [vmem:[#allocation2 + $0x94] sm:$0xf0]  ;;  %v2438_v6 = vld [vmem:[#allocation2 + $0x320] sm:$0xf]  ;;  %v2755_v10 = vld [vmem:[#allocation2 + $0x164] sm:$0xf] }
  0xba   : > { %v3220_v18 = vpack.c.bf16 %v387_v12, %v384_v49  ;;  %v2155_v49 = vor.u32 %v2740_v44, %v2152_v45  ;;  %v2542_v12 = vld [vmem:[#allocation2 + $0x3f8] sm:$0xf] }
  0xbb   : > { %v2543_v20 = vor.u32 %v2841_v15, %v2542_v12  ;;  %v2216_v12 = vld [vmem:[#allocation2 + $0x17c] sm:$0xf0]  ;;  %v2877_v15 = vld [vmem:[#allocation2 + $0x530] sm:$0xf0] }
  0xbc   : > { %1518 = vmatmul.bf16.vlgmr.msrb.gmra.mxu1 %v3220_v18  ;;  %v341_v32 = vpop.f32.mrf.mxu0  ;;  %v360_v33 = vpop.f32.mrf.mxu1  ;;  %1626 = vmatpush.bf16.msra.mxu3 %v2627_v28  ;;  %v2514_v28 = vld [vmem:[#allocation2 + $0x3c0] sm:$0xf] }
  0xbd   : > { %v377_v27 = vpop.f32.mrf.mxu2  ;;  %1662 = vmatpush.bf16.msrb.mxu1 %v2463_v21  ;;  %v342_v40 = vadd.f32 %v341_v32, %v3198_v62  ;;  %v361_v41 = vadd.f32 %v360_v33, %v3200_v63  ;;  %1645 = vmatpush.bf16.msrb.mxu0 %v2183_v34  ;;  %v2404_v62 = vld [vmem:[#allocation2 + $0x2fc] sm:$0xf0]  ;;  %v2099_v21 = vor.u32 %v2726_v16, %v2096_v17  ;;  %v2831_v33 = vld [vmem:[#allocation2 + $0x3c4] sm:$0xf]  ;;  %v2186_v17 = vld [vmem:[#allocation2 + $0x128] sm:$0xf] }
  0xbe   : > { %v378_v39 = vadd.f32 %v377_v27, %v3202_v11  ;;  %1683 = vmatpush.bf16.msrb.mxu2 %v2631_v35  ;;  %v2407_v57 = vor.u32 %v2803_v56, %v2404_v62  ;;  %v2351_v27 = vor.u32 %v2789_v24, %v2348_v25  ;;  %v2515_v31 = vor.u32 %v2834_v29, %v2514_v28  ;;  %v2068_v32 = vld [vmem:[#allocation2 + $0x5c] sm:$0xf0]  ;;  %v2466_v56 = vld [vmem:[#allocation2 + $0x358] sm:$0xf]  ;;  %v2188_v24 = vld [vmem:[#allocation2 + $0x144] sm:$0xf0] }
  0xbf   : > { %v391_v54 = vmax.f32 %v342_v40, 0.0  ;;  %v392_v55 = vmax.f32 %v361_v41, 0.0  ;;  %v2516_v34 = vld [vmem:[#allocation2 + $0x3dc] sm:$0xf0]  ;;  %v2071_v35 = vor.u32 %v2719_v30, %v2068_v32  ;;  %v2323_v40 = vor.u32 %v2782_v36, %v2320_v37  ;;  %v2827_v41 = vld [vmem:[#allocation2 + $0x3a0] sm:$0xf0] }
  0xc0   : > { %v390_v63 = vmax.f32 %v378_v39, 0.0  ;;  %1627 = vmatpush.bf16.msra.mxu3 %v2599_v48  ;;  %v2519_v39 = vor.u32 %v2831_v33, %v2516_v34  ;;  %v2487_v44 = vor.u32 %v2827_v41, %v2486_v38  ;;  %v2775_v48 = vld [vmem:[#allocation2 + $0x204] sm:$0xf]  ;;  %v2870_v28 = vld [vmem:[#allocation2 + $0x4f8] sm:$0xf0] }
  0xc1   : > { %1663 = vmatpush.bf16.msrb.mxu1 %v2435_v42  ;;  %v3228_v58 = vpack.c.bf16 %v391_v54, %v388_v46  ;;  %v3230_v59 = vpack.c.bf16 %v392_v55, %v389_v47  ;;  %1646 = vmatpush.bf16.msrb.mxu0 %v2155_v49  ;;  %v2712_v42 = vld [vmem:[#allocation2 + $0xc] sm:$0xf]  ;;  %v2488_v47 = vld [vmem:[#allocation2 + $0x3a4] sm:$0xf0]  ;;  %v2292_v49 = vld [vmem:[#allocation2 + $0x21c] sm:$0xf0] }
  0xc2   : > { %1684 = vmatpush.bf16.msrb.mxu2 %v2603_v60  ;;  %v2043_v45 = vor.u32 %v2712_v42, %v2040_v43  ;;  %v2824_v46 = vld [vmem:[#allocation2 + $0x38c] sm:$0xf]  ;;  %v2295_v52 = vor.u32 %v2775_v48, %v2292_v49  ;;  %v2242_v54 = vld [vmem:[#allocation2 + $0x198] sm:$0xf]  ;;  %v2765_v55 = vld [vmem:[#allocation2 + $0x1b0] sm:$0xf0] }
  0xc3   : > { %1485 = vmatmul.bf16.gmra.mxu3 %v3228_v58  ;;  %1504 = vmatmul.bf16.gmra.mxu0 %v3230_v59  ;;  %v2491_v53 = vor.u32 %v2824_v46, %v2488_v47  ;;  %v2243_v62 = vor.u32 %v2765_v55, %v2242_v54  ;;  %v2244_v60 = vld [vmem:[#allocation2 + $0x1b4] sm:$0xf0]  ;;  %v2158_v29 = vld [vmem:[#allocation2 + $0xf0] sm:$0xf]  ;;  %v2800_v33 = vld [vmem:[#allocation2 + $0x2c8] sm:$0xf0] }
  0xc4   : > { %1542 = vmatmul.bf16.gmra.mxu2 %v3228_v58  ;;  %1628 = vmatpush.bf16.msra.mxu3 %v2571_v3  ;;  %v2214_v3 = vld [vmem:[#allocation2 + $0x160] sm:$0xf]  ;;  %v2382_v32 = vld [vmem:[#allocation2 + $0x2b0] sm:$0xf]  ;;  %v2741_v36 = vld [vmem:[#allocation2 + $0xf4] sm:$0xf] }
  0xc5   : > { %v379_v2 = vpop.f32.mrf.mxu2  ;;  %1664 = vmatpush.bf16.msrb.mxu1 %v2407_v57  ;;  %1647 = vmatpush.bf16.msrb.mxu0 %v2127_v8  ;;  %v2821_v57 = vld [vmem:[#allocation2 + $0x370] sm:$0xf0]  ;;  %v2215_v8 = vor.u32 %v2758_v5, %v2214_v3  ;;  %v2160_v37 = vld [vmem:[#allocation2 + $0x10c] sm:$0xf0]  ;;  %v2634_v38 = vld [vmem:[#allocation2 + $0x4a8] sm:$0xf] }
  0xc6   : > { %v380_v7 = vadd.f32 %v379_v2, %v3202_v11  ;;  %v2544_v11 = vld [vmem:[#allocation2 + $0x414] sm:$0xf0]  ;;  %1685 = vmatpush.bf16.msrb.mxu2 %v2575_v13  ;;  %v2467_v61 = vor.u32 %v2821_v57, %v2466_v56  ;;  %v2264_v2 = vld [vmem:[#allocation2 + $0x1e4] sm:$0xf0]  ;;  %v2219_v13 = vor.u32 %v2755_v10, %v2216_v12  ;;  %v2163_v41 = vor.u32 %v2741_v36, %v2160_v37  ;;  %v2737_v43 = vld [vmem:[#allocation2 + $0xd0] sm:$0xf0] }
  0xc7   : > { %v2547_v26 = vor.u32 %v2838_v22, %v2544_v11  ;;  %v2267_v4 = vor.u32 %v2768_v1, %v2264_v2  ;;  %v2807_v22 = vld [vmem:[#allocation2 + $0x300] sm:$0xf0]  ;;  %v2748_v11 = vld [vmem:[#allocation2 + $0x12c] sm:$0xf]  ;;  %v2130_v42 = vld [vmem:[#allocation2 + $0xb8] sm:$0xf] }
  0xc8   : > { %v393_v19 = vmax.f32 %v380_v7, 0.0  ;;  %1629 = vmatpush.bf16.msra.mxu3 %v2543_v20  ;;  %v2814_v7 = vld [vmem:[#allocation2 + $0x338] sm:$0xf0]  ;;  %v2410_v20 = vld [vmem:[#allocation2 + $0x2e8] sm:$0xf] }
  0xc9   : > { %1665 = vmatpush.bf16.msrb.mxu1 %v2379_v14  ;;  %1648 = vmatpush.bf16.msrb.mxu0 %v2099_v21  ;;  %v2439_v9 = vor.u32 %v2814_v7, %v2438_v6  ;;  %v2690_v14 = vld [vmem:[#allocation2 + $0x518] sm:$0xf]  ;;  %v2411_v25 = vor.u32 %v2807_v22, %v2410_v20  ;;  %v2793_v46 = vld [vmem:[#allocation2 + $0x290] sm:$0xf0]  ;;  %v2734_v47 = vld [vmem:[#allocation2 + $0xbc] sm:$0xf] }
  0xca   : > { %v3236_v23 = vpack.c.bf16 %v393_v19, %v390_v63  ;;  %1686 = vmatpush.bf16.msrb.mxu2 %v2547_v26  ;;  %v2762_v63 = vld [vmem:[#allocation2 + $0x19c] sm:$0xf]  ;;  %v2691_v16 = vor.u32 %v2877_v15, %v2690_v14  ;;  %v2751_v19 = vld [vmem:[#allocation2 + $0x140] sm:$0xf0]  ;;  %v2191_v26 = vor.u32 %v2748_v11, %v2188_v24  ;;  %v2132_v48 = vld [vmem:[#allocation2 + $0xd4] sm:$0xf0] }
  0xcb   : > { %v2247_v0 = vor.u32 %v2762_v63, %v2244_v60  ;;  %v2187_v21 = vor.u32 %v2751_v19, %v2186_v17  ;;  %v2102_v54 = vld [vmem:[#allocation2 + $0x80] sm:$0xf]  ;;  %v2135_v55 = vor.u32 %v2734_v47, %v2132_v48  ;;  %v2786_v63 = vld [vmem:[#allocation2 + $0x258] sm:$0xf0]  ;;  %v2578_v2 = vld [vmem:[#allocation2 + $0x438] sm:$0xf] }
  0xcc   : > { %1523 = vmatmul.bf16.gmra.mxu1 %v3236_v23  ;;  %1630 = vmatpush.bf16.msra.mxu3 %v2515_v31  ;;  %v2744_v31 = vld [vmem:[#allocation2 + $0x108] sm:$0xf0]  ;;  %v2326_v57 = vld [vmem:[#allocation2 + $0x240] sm:$0xf]  ;;  %v2849_v3 = vld [vmem:[#allocation2 + $0x450] sm:$0xf0] }
  0xcd   : > { %1666 = vmatpush.bf16.msrb.mxu1 %v2351_v27  ;;  %1649 = vmatpush.bf16.msrb.mxu0 %v2071_v35  ;;  %v2662_v27 = vld [vmem:[#allocation2 + $0x4e0] sm:$0xf]  ;;  %v2159_v34 = vor.u32 %v2744_v31, %v2158_v29  ;;  %v2383_v35 = vor.u32 %v2800_v33, %v2382_v32  ;;  %v2579_v5 = vor.u32 %v2849_v3, %v2578_v2  ;;  %v2074_v6 = vld [vmem:[#allocation2 + $0x48] sm:$0xf]  ;;  %v2723_v7 = vld [vmem:[#allocation2 + $0x60] sm:$0xf0] }
  0xce   : > { %1687 = vmatpush.bf16.msrb.mxu2 %v2519_v39  ;;  %v2663_v30 = vor.u32 %v2870_v28, %v2662_v27  ;;  %v2863_v39 = vld [vmem:[#allocation2 + $0x4c0] sm:$0xf0]  ;;  %v2104_v1 = vld [vmem:[#allocation2 + $0x9c] sm:$0xf0]  ;;  %v2720_v12 = vld [vmem:[#allocation2 + $0x4c] sm:$0xf] }
  0xcf   : > { %v2779_v10 = vld [vmem:[#allocation2 + $0x220] sm:$0xf0]  ;;  %v2550_v15 = vld [vmem:[#allocation2 + $0x400] sm:$0xf]  ;;  %v2046_v17 = vld [vmem:[#allocation2 + $0x10] sm:$0xf] }
  0xd0   : > { %1631 = vmatpush.bf16.msra.mxu3 %v2487_v44  ;;  %v2354_v44 = vld [vmem:[#allocation2 + $0x278] sm:$0xf]  ;;  %v2270_v22 = vld [vmem:[#allocation2 + $0x1d0] sm:$0xf]  ;;  %v2772_v11 = vld [vmem:[#allocation2 + $0x1e8] sm:$0xf0] }
  0xd1   : > { %1667 = vmatpush.bf16.msrb.mxu1 %v2323_v40  ;;  %1650 = vmatpush.bf16.msrb.mxu0 %v2043_v45  ;;  %v2635_v40 = vor.u32 %v2863_v39, %v2634_v38  ;;  %v2131_v45 = vor.u32 %v2737_v43, %v2130_v42  ;;  %v2355_v49 = vor.u32 %v2793_v46, %v2354_v44  ;;  %v2048_v27 = vld [vmem:[#allocation2 + $0x2c] sm:$0xf0]  ;;  %v2522_v28 = vld [vmem:[#allocation2 + $0x3c8] sm:$0xf]  ;;  %v2835_v29 = vld [vmem:[#allocation2 + $0x3e0] sm:$0xf0] }
  0xd2   : > { %1688 = vmatpush.bf16.msrb.mxu2 %v2491_v53  ;;  %v2856_v53 = vld [vmem:[#allocation2 + $0x488] sm:$0xf0]  ;;  %v2818_v32 = vld [vmem:[#allocation2 + $0x35c] sm:$0xf]  ;;  %v2468_v33 = vld [vmem:[#allocation2 + $0x374] sm:$0xf0] }
  0xd3   : > { %1556 = vmatmul.bf16.vlgmr.msrb.gmra.mxu3 %v3214_v51  ;;  %1575 = vmatmul.bf16.vlgmr.msra.gmra.mxu0 %v3220_v18  ;;  %v2692_v36 = vld [vmem:[#allocation2 + $0x534] sm:$0xf0]  ;;  %v2474_v37 = vld [vmem:[#allocation2 + $0x360] sm:$0xf]  ;;  %v2822_v38 = vld [vmem:[#allocation2 + $0x378] sm:$0xf0] }
  0xd4   : > { %1613 = vmatmul.bf16.vlgmr.msra.gmra.mxu2 %v3214_v51  ;;  %1700 = vmatpush.bf16.msrb.mxu3 %v2243_v62  ;;  %v2730_v62 = vld [vmem:[#allocation2 + $0x98] sm:$0xf0]  ;;  %v2828_v42 = vld [vmem:[#allocation2 + $0x3a8] sm:$0xf0]  ;;  %v2811_v43 = vld [vmem:[#allocation2 + $0x324] sm:$0xf] }
  0xd5   : > { %1668 = vmatpush.bf16.msrb.mxu1 %v2295_v52  ;;  %1719 = vmatpush.bf16.msra.mxu0 %v2467_v61  ;;  %v2606_v52 = vld [vmem:[#allocation2 + $0x470] sm:$0xf]  ;;  %v2103_v60 = vor.u32 %v2730_v62, %v2102_v54  ;;  %v2327_v61 = vor.u32 %v2786_v63, %v2326_v57  ;;  %v2867_v46 = vld [vmem:[#allocation2 + $0x4e4] sm:$0xf]  ;;  %v2664_v47 = vld [vmem:[#allocation2 + $0x4fc] sm:$0xf0] }
  0xd6   : > { %1757 = vmatpush.bf16.msra.mxu2 %v2247_v0  ;;  %v2607_v56 = vor.u32 %v2856_v53, %v2606_v52  ;;  %v2727_v0 = vld [vmem:[#allocation2 + $0x84] sm:$0xf]  ;;  %v2446_v52 = vld [vmem:[#allocation2 + $0x328] sm:$0xf]  ;;  %v2804_v57 = vld [vmem:[#allocation2 + $0x2ec] sm:$0xf] }
  0xd7   : > { %v2815_v53 = vld [vmem:[#allocation2 + $0x340] sm:$0xf0]  ;;  %v2412_v63 = vld [vmem:[#allocation2 + $0x304] sm:$0xf0]  ;;  %v2808_v2 = vld [vmem:[#allocation2 + $0x308] sm:$0xf0] }
  0xd8   : > { %1701 = vmatpush.bf16.msrb.mxu3 %v2215_v8  ;;  %v2298_v8 = vld [vmem:[#allocation2 + $0x208] sm:$0xf]  ;;  %v2447_v54 = vor.u32 %v2815_v53, %v2446_v52  ;;  %v2306_v53 = vld [vmem:[#allocation2 + $0x210] sm:$0xf] }
  0xd9   : > { %1669 = vmatpush.bf16.msrb.mxu1 %v2267_v4  ;;  %1720 = vmatpush.bf16.msra.mxu0 %v2439_v9  ;;  %v2107_v4 = vor.u32 %v2727_v0, %v2104_v1  ;;  %v2075_v9 = vor.u32 %v2723_v7, %v2074_v6  ;;  %v2299_v14 = vor.u32 %v2779_v10, %v2298_v8  ;;  %v2636_v0 = vld [vmem:[#allocation2 + $0x4c4] sm:$0xf0]  ;;  %v2418_v1 = vld [vmem:[#allocation2 + $0x2f0] sm:$0xf]  ;;  %v2759_v6 = vld [vmem:[#allocation2 + $0x180] sm:$0xf0] }
  0xda   : > { %1758 = vmatpush.bf16.msra.mxu2 %v2219_v13  ;;  %v2076_v13 = vld [vmem:[#allocation2 + $0x64] sm:$0xf0]  ;;  %v2797_v7 = vld [vmem:[#allocation2 + $0x2b4] sm:$0xf] }
  0xdb   : > { %v2079_v19 = vor.u32 %v2720_v12, %v2076_v13  ;;  %v2853_v10 = vld [vmem:[#allocation2 + $0x474] sm:$0xf]  ;;  %v2608_v12 = vld [vmem:[#allocation2 + $0x48c] sm:$0xf0]  ;;  %v2524_v52 = vld [vmem:[#allocation2 + $0x3e4] sm:$0xf0] }
  0xdc   : > { %1594 = vmatmul.bf16.vlgmr.msra.gmra.mxu1 %v3212_v50  ;;  %1702 = vmatpush.bf16.msrb.mxu3 %v2187_v21  ;;  %v2716_v21 = vld [vmem:[#allocation2 + $0x28] sm:$0xf0] }
  0xdd   : > { %1738 = vmatpush.bf16.msra.mxu1 %v2691_v16  ;;  %1721 = vmatpush.bf16.msra.mxu0 %v2411_v25  ;;  %v2842_v16 = vld [vmem:[#allocation2 + $0x418] sm:$0xf0]  ;;  %v2047_v24 = vor.u32 %v2716_v21, %v2046_v17  ;;  %v2271_v25 = vor.u32 %v2772_v11, %v2270_v22  ;;  %v2194_v17 = vld [vmem:[#allocation2 + $0x130] sm:$0xf]  ;;  %v2356_v11 = vld [vmem:[#allocation2 + $0x294] sm:$0xf0] }
  0xde   : > { %1759 = vmatpush.bf16.msra.mxu2 %v2191_v26  ;;  %v2551_v20 = vor.u32 %v2842_v16, %v2550_v15  ;;  %v2713_v26 = vld [vmem:[#allocation2 + $0x14] sm:$0xf]  ;;  %v2390_v15 = vld [vmem:[#allocation2 + $0x2b8] sm:$0xf]  ;;  %v2790_v22 = vld [vmem:[#allocation2 + $0x27c] sm:$0xf] }
  0xdf   : > { %v2051_v31 = vor.u32 %v2713_v26, %v2048_v27  ;;  %v2801_v16 = vld [vmem:[#allocation2 + $0x2d0] sm:$0xf0]  ;;  %v2580_v26 = vld [vmem:[#allocation2 + $0x454] sm:$0xf0]  ;;  %v2362_v27 = vld [vmem:[#allocation2 + $0x280] sm:$0xf] }
  0xe0   : > { %1703 = vmatpush.bf16.msrb.mxu3 %v2159_v34  ;;  %v2874_v34 = vld [vmem:[#allocation2 + $0x51c] sm:$0xf]  ;;  %v2391_v21 = vor.u32 %v2801_v16, %v2390_v15  ;;  %v2717_v15 = vld [vmem:[#allocation2 + $0x30] sm:$0xf0] }
  0xe1   : > { %1739 = vmatpush.bf16.msra.mxu1 %v2663_v30  ;;  %1722 = vmatpush.bf16.msra.mxu0 %v2383_v35  ;;  %v2523_v30 = vor.u32 %v2835_v29, %v2522_v28  ;;  %v2471_v35 = vor.u32 %v2818_v32, %v2468_v33  ;;  %v2695_v39 = vor.u32 %v2874_v34, %v2692_v36  ;;  %v2794_v28 = vld [vmem:[#allocation2 + $0x298] sm:$0xf0]  ;;  %v2783_v32 = vld [vmem:[#allocation2 + $0x244] sm:$0xf] }
  0xe2   : > { %1760 = vmatpush.bf16.msra.mxu2 %v2163_v41  ;;  %v2494_v41 = vld [vmem:[#allocation2 + $0x390] sm:$0xf]  ;;  %v2363_v33 = vor.u32 %v2794_v28, %v2362_v27  ;;  %v2839_v36 = vld [vmem:[#allocation2 + $0x404] sm:$0xf]  ;;  %v2586_v27 = vld [vmem:[#allocation2 + $0x440] sm:$0xf] }
  0xe3   : > { %1561 = vmatmul.bf16.gmra.mxu3 %v3230_v59  ;;  %1580 = vmatmul.bf16.gmra.mxu0 %v3236_v23  ;;  %v2495_v44 = vor.u32 %v2828_v42, %v2494_v41  ;;  %v2787_v41 = vld [vmem:[#allocation2 + $0x260] sm:$0xf0]  ;;  %v2138_v42 = vld [vmem:[#allocation2 + $0xc0] sm:$0xf]  ;;  %v2850_v28 = vld [vmem:[#allocation2 + $0x458] sm:$0xf0] }
  0xe4   : > { %1618 = vmatmul.bf16.gmra.mxu2 %v3230_v59  ;;  %1704 = vmatpush.bf16.msrb.mxu3 %v2131_v45  ;;  %v2440_v45 = vld [vmem:[#allocation2 + $0x33c] sm:$0xf0] }
  0xe5   : > { %1740 = vmatpush.bf16.msra.mxu1 %v2635_v40  ;;  %1723 = vmatpush.bf16.msra.mxu0 %v2355_v49  ;;  %v2475_v40 = vor.u32 %v2822_v38, %v2474_v37  ;;  %v2443_v48 = vor.u32 %v2811_v43, %v2440_v45  ;;  %v2667_v49 = vor.u32 %v2867_v46, %v2664_v47  ;;  %v2552_v37 = vld [vmem:[#allocation2 + $0x41c] sm:$0xf0]  ;;  %v2738_v43 = vld [vmem:[#allocation2 + $0xd8] sm:$0xf0]  ;;  %v2776_v46 = vld [vmem:[#allocation2 + $0x20c] sm:$0xf] }
  0xe6   : > { %1761 = vmatpush.bf16.msra.mxu2 %v2135_v55  ;;  %v2250_v55 = vld [vmem:[#allocation2 + $0x1a0] sm:$0xf]  ;;  %v2139_v45 = vor.u32 %v2738_v43, %v2138_v42  ;;  %v2300_v47 = vld [vmem:[#allocation2 + $0x224] sm:$0xf0] }
  0xe8   : > { %1705 = vmatpush.bf16.msrb.mxu3 %v2103_v60  ;;  %v2860_v60 = vld [vmem:[#allocation2 + $0x4ac] sm:$0xf] }
  0xe9   : > { %1741 = vmatpush.bf16.msra.mxu1 %v2607_v56  ;;  %1724 = vmatpush.bf16.msra.mxu0 %v2327_v61  ;;  %v2766_v56 = vld [vmem:[#allocation2 + $0x1b8] sm:$0xf0]  ;;  %v2415_v61 = vor.u32 %v2804_v57, %v2412_v63  ;;  %v2639_v3 = vor.u32 %v2860_v60, %v2636_v0  ;;  %v2769_v57 = vld [vmem:[#allocation2 + $0x1d4] sm:$0xf] }
  0xea   : > { %1762 = vmatpush.bf16.msra.mxu2 %v2107_v4  ;;  %v2251_v62 = vor.u32 %v2766_v56, %v2250_v55  ;;  %v2419_v4 = vor.u32 %v2808_v2, %v2418_v1  ;;  %v2110_v56 = vld [vmem:[#allocation2 + $0x88] sm:$0xf]  ;;  %v2825_v1 = vld [vmem:[#allocation2 + $0x394] sm:$0xf]  ;;  %v2496_v2 = vld [vmem:[#allocation2 + $0x3ac] sm:$0xf0] }
  0xec   : > { %1599 = vmatmul.bf16.gmra.mxu1 %v3228_v58  ;;  %1706 = vmatpush.bf16.msrb.mxu3 %v2075_v9  ;;  %v2384_v9 = vld [vmem:[#allocation2 + $0x2cc] sm:$0xf0] }
  0xed   : > { %1742 = vmatpush.bf16.msra.mxu1 %v2579_v5  ;;  %1725 = vmatpush.bf16.msra.mxu0 %v2299_v14  ;;  %v2222_v5 = vld [vmem:[#allocation2 + $0x168] sm:$0xf]  ;;  %v2387_v13 = vor.u32 %v2797_v7, %v2384_v9  ;;  %v2611_v14 = vor.u32 %v2853_v10, %v2608_v12  ;;  %v2724_v7 = vld [vmem:[#allocation2 + $0x68] sm:$0xf0]  ;;  %v2698_v10 = vld [vmem:[#allocation2 + $0x520] sm:$0xf] }
  0xee   : > { %1763 = vmatpush.bf16.msra.mxu2 %v2079_v19  ;;  %v2223_v8 = vor.u32 %v2759_v6, %v2222_v5  ;;  %v2752_v19 = vld [vmem:[#allocation2 + $0x148] sm:$0xf0]  ;;  %v2773_v5 = vld [vmem:[#allocation2 + $0x1f0] sm:$0xf0]  ;;  %v2082_v6 = vld [vmem:[#allocation2 + $0x50] sm:$0xf] }
  0xef   : > { %v2083_v9 = vor.u32 %v2724_v7, %v2082_v6  ;;  %v2878_v12 = vld [vmem:[#allocation2 + $0x538] sm:$0xf0] }
  0xf0   : > { %1707 = vmatpush.bf16.msrb.mxu3 %v2047_v24  ;;  %v2846_v24 = vld [vmem:[#allocation2 + $0x43c] sm:$0xf] }
  0xf1   : > { %1743 = vmatpush.bf16.msra.mxu1 %v2551_v20  ;;  %1726 = vmatpush.bf16.msra.mxu0 %v2271_v25  ;;  %v2195_v20 = vor.u32 %v2752_v19, %v2194_v17  ;;  %v2359_v25 = vor.u32 %v2790_v22, %v2356_v11  ;;  %v2583_v29 = vor.u32 %v2846_v24, %v2580_v26  ;;  %v2670_v17 = vld [vmem:[#allocation2 + $0x4e8] sm:$0xf]  ;;  %v2871_v19 = vld [vmem:[#allocation2 + $0x500] sm:$0xf0]  ;;  %v2864_v22 = vld [vmem:[#allocation2 + $0x4c8] sm:$0xf0] }
  0xf2   : > { %1764 = vmatpush.bf16.msra.mxu2 %v2051_v31  ;;  %v2745_v31 = vld [vmem:[#allocation2 + $0x110] sm:$0xf0]  ;;  %v2614_v24 = vld [vmem:[#allocation2 + $0x478] sm:$0xf] }
  0xf3   : > { %1632 = vmatmul.bf16.vlgmr.msra.gmra.mxu3 %v3220_v18  ;;  %1651 = vmatmul.bf16.vlgmr.msrb.gmra.mxu0 %v3212_v50 }
  0xf4   : > { %1689 = vmatmul.bf16.vlgmr.msrb.gmra.mxu2 %v3220_v18  ;;  %1776 = vmatpush.bf16.msra.mxu3 %v2471_v35  ;;  %v2328_v35 = vld [vmem:[#allocation2 + $0x25c] sm:$0xf0] }
  0xf5   : > { %1744 = vmatpush.bf16.msra.mxu1 %v2523_v30  ;;  %1795 = vmatpush.bf16.msrb.mxu0 %v2695_v39  ;;  %v2166_v30 = vld [vmem:[#allocation2 + $0xf8] sm:$0xf]  ;;  %v2331_v38 = vor.u32 %v2783_v32, %v2328_v35  ;;  %v2555_v39 = vor.u32 %v2839_v36, %v2552_v37  ;;  %v2829_v37 = vld [vmem:[#allocation2 + $0x3b0] sm:$0xf0] }
  0xf6   : > { %1833 = vmatpush.bf16.msrb.mxu2 %v2475_v40  ;;  %v2167_v34 = vor.u32 %v2745_v31, %v2166_v30  ;;  %v2334_v40 = vld [vmem:[#allocation2 + $0x248] sm:$0xf]  ;;  %v2843_v31 = vld [vmem:[#allocation2 + $0x420] sm:$0xf0]  ;;  %v2502_v36 = vld [vmem:[#allocation2 + $0x398] sm:$0xf] }
  0xf7   : > { %v2558_v30 = vld [vmem:[#allocation2 + $0x408] sm:$0xf] }
  0xf8   : > { %1777 = vmatpush.bf16.msra.mxu3 %v2443_v48  ;;  %v2832_v48 = vld [vmem:[#allocation2 + $0x3cc] sm:$0xf]  ;;  %v2559_v32 = vor.u32 %v2843_v31, %v2558_v30 }
  0xf9   : > { %1745 = vmatpush.bf16.msra.mxu1 %v2495_v44  ;;  %1796 = vmatpush.bf16.msrb.mxu0 %v2667_v49  ;;  %v2335_v44 = vor.u32 %v2787_v41, %v2334_v40  ;;  %v2303_v49 = vor.u32 %v2776_v46, %v2300_v47  ;;  %v2527_v55 = vor.u32 %v2832_v48, %v2524_v52  ;;  %v3266_v40 = vld [vmem:[%s3356_s4] sm:$0xff] }
  0xfa   : > { %1834 = vmatpush.bf16.msrb.mxu2 %v2447_v54  ;;  %v2780_v54 = vld [vmem:[#allocation2 + $0x228] sm:$0xf0]  ;;  %v594_v41 = vperm.slane %v3266_v40, 0 }
  0xfb   : > { %v2307_v63 = vor.u32 %v2780_v54, %v2306_v53 }
  0xfc   : > { %1670 = vmatmul.bf16.vlgmr.msrb.gmra.mxu1 %v3214_v51  ;;  %1778 = vmatpush.bf16.msra.mxu3 %v2415_v61  ;;  %v2272_v61 = vld [vmem:[#allocation2 + $0x1ec] sm:$0xf0] }
  0xfd   : > { %1814 = vmatpush.bf16.msrb.mxu1 %v2251_v62  ;;  %1797 = vmatpush.bf16.msrb.mxu0 %v2639_v3  ;;  %v2731_v62 = vld [vmem:[#allocation2 + $0xa0] sm:$0xf0]  ;;  %v2275_v0 = vor.u32 %v2769_v57, %v2272_v61  ;;  %v2278_v3 = vld [vmem:[#allocation2 + $0x1d8] sm:$0xf] }
  0xfe   : > { %1835 = vmatpush.bf16.msrb.mxu2 %v2419_v4  ;;  %v2111_v60 = vor.u32 %v2731_v62, %v2110_v56  ;;  %v2499_v4 = vor.u32 %v2825_v1, %v2496_v2 }
 0x100   : > { %1779 = vmatpush.bf16.msra.mxu3 %v2387_v13  ;;  %v2699_v13 = vor.u32 %v2878_v12, %v2698_v10 }
 0x101   : > { %1815 = vmatpush.bf16.msrb.mxu1 %v2223_v8  ;;  %1798 = vmatpush.bf16.msrb.mxu0 %v2611_v14  ;;  %v2279_v8 = vor.u32 %v2773_v5, %v2278_v3  ;;  %v2054_v14 = vld [vmem:[#allocation2 + $0x18] sm:$0xf] }
 0x102   : > { %1836 = vmatpush.bf16.msrb.mxu2 %v2391_v21  ;;  %v2055_v16 = vor.u32 %v2717_v15, %v2054_v14  ;;  %v2642_v21 = vld [vmem:[#allocation2 + $0x4b0] sm:$0xf] }
 0x103   : > { %1637 = vmatmul.bf16.gmra.mxu3 %v3236_v23  ;;  %1656 = vmatmul.bf16.gmra.mxu0 %v3228_v58  ;;  %v2643_v11 = vor.u32 %v2864_v22, %v2642_v21 }
 0x104   : > { %1694 = vmatmul.bf16.gmra.mxu2 %v3236_v23  ;;  %1780 = vmatpush.bf16.msra.mxu3 %v2359_v25  ;;  %v2857_v25 = vld [vmem:[#allocation2 + $0x490] sm:$0xf0] }
 0x105   : > { %1816 = vmatpush.bf16.msrb.mxu1 %v2195_v20  ;;  %1799 = vmatpush.bf16.msrb.mxu0 %v2583_v29  ;;  %v2671_v20 = vor.u32 %v2871_v19, %v2670_v17  ;;  %v2615_v26 = vor.u32 %v2857_v25, %v2614_v24  ;;  %v2587_v29 = vor.u32 %v2850_v28, %v2586_v27 }
 0x106   : > { %1837 = vmatpush.bf16.msrb.mxu2 %v2363_v33  ;;  %v2530_v33 = vld [vmem:[#allocation2 + $0x3d0] sm:$0xf] }
 0x108   : > { %1781 = vmatpush.bf16.msra.mxu3 %v2331_v38  ;;  %v2503_v38 = vor.u32 %v2829_v37, %v2502_v36  ;;  %v597_v37 = vperm.slane %v3266_v40, 3 }
 0x109   : > { %1817 = vmatpush.bf16.msrb.mxu1 %v2167_v34  ;;  %1800 = vmatpush.bf16.msrb.mxu0 %v2555_v39  ;;  %v2836_v34 = vld [vmem:[#allocation2 + $0x3e8] sm:$0xf0] }
 0x10a   : > { %1838 = vmatpush.bf16.msrb.mxu2 %v2335_v44  ;;  %v2531_v35 = vor.u32 %v2836_v34, %v2530_v33 }
 0x10c   : > { %1675 = vmatmul.bf16.gmra.mxu1 %v3230_v59  ;;  %1782 = vmatpush.bf16.msra.mxu3 %v2303_v49 }
 0x10d   : > { %1818 = vmatpush.bf16.msrb.mxu1 %v2139_v45  ;;  %1801 = vmatpush.bf16.msrb.mxu0 %v2527_v55 }
 0x10e   : > { %1839 = vmatpush.bf16.msrb.mxu2 %v2307_v63 }
 0x110   : > { %1783 = vmatpush.bf16.msra.mxu3 %v2275_v0 }
 0x111   : > { %1819 = vmatpush.bf16.msrb.mxu1 %v2111_v60  ;;  %1802 = vmatpush.bf16.msrb.mxu0 %v2499_v4 }
 0x112   : > { %1840 = vmatpush.bf16.msrb.mxu2 %v2279_v8 }
 0x113   : > { %1708 = vmatmul.bf16.vlgmr.msrb.gmra.mxu3 %v3212_v50  ;;  %1727 = vmatmul.bf16.vlgmr.msra.gmra.mxu0 %v3214_v51 }
 0x114   : > { %1765 = vmatmul.bf16.vlgmr.msra.gmra.mxu2 %v3212_v50  ;;  %2879 = vmatpush.bf16.msrb.mxu3 %v2699_v13 }
 0x115   : > { %1820 = vmatpush.bf16.msrb.mxu1 %v2083_v9  ;;  %1852 = vmatpush.bf16.msra.mxu0 %v2699_v13 }
 0x118   : > { %2880 = vmatpush.bf16.msrb.mxu3 %v2671_v20 }
 0x119   : > { %1821 = vmatpush.bf16.msrb.mxu1 %v2055_v16  ;;  %1853 = vmatpush.bf16.msra.mxu0 %v2671_v20 }
 0x11c   : > { %1746 = vmatmul.bf16.vlgmr.msra.gmra.mxu1 %v3220_v18  ;;  %2881 = vmatpush.bf16.msrb.mxu3 %v2643_v11 }
 0x11d   : > { %1854 = vmatpush.bf16.msra.mxu0 %v2643_v11 }
 0x120   : > { %2882 = vmatpush.bf16.msrb.mxu3 %v2615_v26 }
 0x121   : > { %1855 = vmatpush.bf16.msra.mxu0 %v2615_v26 }
 0x123   : > { %1713 = vmatmul.bf16.gmra.mxu3 %v3228_v58  ;;  %1732 = vmatmul.bf16.gmra.mxu0 %v3230_v59 }
 0x124   : > { %1770 = vmatmul.bf16.gmra.mxu2 %v3228_v58  ;;  %2883 = vmatpush.bf16.msrb.mxu3 %v2587_v29 }
 0x125   : > { %1856 = vmatpush.bf16.msra.mxu0 %v2587_v29  ;;  %v596_v29 = vperm.slane %v3266_v40, 2 }
 0x128   : > { %2884 = vmatpush.bf16.msrb.mxu3 %v2559_v32 }
 0x129   : > { %1857 = vmatpush.bf16.msra.mxu0 %v2559_v32 }
 0x12c   : > { %1751 = vmatmul.bf16.gmra.mxu1 %v3236_v23  ;;  %2885 = vmatpush.bf16.msrb.mxu3 %v2531_v35 }
 0x12d   : > { %1858 = vmatpush.bf16.msra.mxu0 %v2531_v35 }
 0x130   : > { %v1500_v39 = vpop.f32.mrf.mxu0  ;;  %2886 = vmatpush.bf16.msrb.mxu3 %v2503_v38 }
 0x131   : > { %1859 = vmatpush.bf16.msra.mxu0 %v2503_v38 }
 0x133   : > { %1784 = vmatmul.bf16.vlgmr.msra.gmra.mxu3 %v3214_v51  ;;  %1803 = vmatmul.bf16.vlgmr.msrb.gmra.mxu0 %v3220_v18 }
 0x134   : > { %1841 = vmatmul.bf16.vlgmr.msrb.gmra.mxu2 %v3214_v51 }
 0x136   : > { %v1481_v42 = vpop.f32.mrf.mxu3 }
 0x137   : > { %v1482_v43 = vadd.f32 %v1481_v42, %v594_v41  ;;  %v1538_v45 = vpop.f32.mrf.mxu2 }
 0x138   : > { %v1502_v46 = vpop.f32.mrf.mxu0 }
 0x139   : > { %v1519_v44 = vpop.f32.mrf.mxu1  ;;  %v1501_v47 = vadd.f32 %v1500_v39, %v1482_v43 }
 0x13b   : > { %v1520_v48 = vadd.f32 %v1519_v44, %v1501_v47 }
 0x13c   : > { %1822 = vmatmul.bf16.vlgmr.msrb.gmra.mxu1 %v3212_v50 }
 0x13d   : > { %1871 = vst [vmem:[%s3276_s26] sm:$0xff] %v1520_v48 }
 0x13e   : > { %v1483_v49 = vpop.f32.mrf.mxu3 }
 0x13f   : > { %v1484_v52 = vadd.f32 %v1483_v49, %v594_v41  ;;  %v1540_v51 = vpop.f32.mrf.mxu2 }
 0x140   : > { %v1505_v54 = vpop.f32.mrf.mxu0 }
 0x141   : > { %v1521_v53 = vpop.f32.mrf.mxu1  ;;  %v1503_v55 = vadd.f32 %v1502_v46, %v1484_v52 }
 0x143   : > { %v1522_v56 = vadd.f32 %v1521_v53, %v1503_v55  ;;  %1789 = vmatmul.bf16.gmra.mxu3 %v3230_v59  ;;  %1808 = vmatmul.bf16.gmra.mxu0 %v3236_v23 }
 0x144   : > { %1846 = vmatmul.bf16.gmra.mxu2 %v3230_v59  ;;  %v595_v59 = vperm.slane %v3266_v40, 1 }
 0x145   : > { %1878 = vst [vmem:[%s3276_s26 + $0x38] sm:$0xff] %v1522_v56 }
 0x146   : > { %v1486_v50 = vpop.f32.mrf.mxu3  ;;  %v1539_v8 = vadd.f32 %v1538_v45, %v595_v59  ;;  %v1541_v15 = vadd.f32 %v1540_v51, %v595_v59 }
 0x147   : > { %v1487_v62 = vadd.f32 %v1486_v50, %v594_v41  ;;  %v1543_v63 = vpop.f32.mrf.mxu2 }
 0x148   : > { %v1507_v60 = vpop.f32.mrf.mxu0 }
 0x149   : > { %v1524_v57 = vpop.f32.mrf.mxu1  ;;  %v1506_v61 = vadd.f32 %v1505_v54, %v1487_v62 }
 0x14b   : > { %v1525_v0 = vadd.f32 %v1524_v57, %v1506_v61 }
 0x14c   : > { %1827 = vmatmul.bf16.gmra.mxu1 %v3228_v58 }
 0x14d   : > { %1885 = vst [vmem:[%s3276_s26 + $0x70] sm:$0xff] %v1525_v0 }
 0x14e   : > { %v1488_v1 = vpop.f32.mrf.mxu3 }
 0x14f   : > { %v1489_v2 = vadd.f32 %v1488_v1, %v594_v41  ;;  %v1545_v4 = vpop.f32.mrf.mxu2 }
 0x150   : > { %v1576_v5 = vpop.f32.mrf.mxu0  ;;  %v1546_v28 = vadd.f32 %v1545_v4, %v595_v59 }
 0x151   : > { %v1526_v3 = vpop.f32.mrf.mxu1  ;;  %v1508_v6 = vadd.f32 %v1507_v60, %v1489_v2 }
 0x153   : > { %v1527_v7 = vadd.f32 %v1526_v3, %v1508_v6  ;;  %1860 = vmatmul.bf16.vlgmr.msra.gmra.mxu0 %v3220_v18  ;;  %1865 = vmatmul.bf16.vlgmr.msrb.gmra.mxu3 %v3236_v23  ;;  %v1544_v23 = vadd.f32 %v1543_v63, %v595_v59 }
 0x155   : > { %1892 = vst [vmem:[%s3276_s26 + $0xa8] sm:$0xff] %v1527_v7 }
 0x156   : > { %v1557_v58 = vpop.f32.mrf.mxu3 }
 0x157   : > { %v1558_v9 = vadd.f32 %v1557_v58, %v1539_v8  ;;  %v1614_v12 = vpop.f32.mrf.mxu2 }
 0x158   : > { %v1578_v13 = vpop.f32.mrf.mxu0 }
 0x159   : > { %v1595_v10 = vpop.f32.mrf.mxu1  ;;  %v1577_v14 = vadd.f32 %v1576_v5, %v1558_v9 }
 0x15a   : > { %v1596_v35 = vadd.f32 %v1595_v10, %v596_v29 }
 0x15b   : > { %1872 = vst [vmem:[%s3276_s26 + $0x8] sm:$0xff] %v1577_v14 }
 0x15c   : > { %v1615_v38 = vadd.f32 %v1614_v12, %v1596_v35 }
 0x15e   : > { %v1559_v16 = vpop.f32.mrf.mxu3 }
 0x15f   : > { %v1560_v17 = vadd.f32 %v1559_v16, %v1541_v15  ;;  %v1616_v20 = vpop.f32.mrf.mxu2  ;;  %v598_v15 = vperm.slane %v3266_v40, 4 }
 0x160   : > { %v1581_v21 = vpop.f32.mrf.mxu0 }
 0x161   : > { %v1597_v19 = vpop.f32.mrf.mxu1  ;;  %v1579_v18 = vadd.f32 %v1578_v13, %v1560_v17 }
 0x162   : > { %v1598_v47 = vadd.f32 %v1597_v19, %v596_v29 }
 0x163   : > { %1879 = vst [vmem:[%s3276_s26 + $0x40] sm:$0xff] %v1579_v18 }
 0x164   : > { %v1617_v49 = vadd.f32 %v1616_v20, %v1598_v47 }
 0x166   : > { %v1562_v22 = vpop.f32.mrf.mxu3 }
 0x167   : > { %v1563_v11 = vadd.f32 %v1562_v22, %v1544_v23  ;;  %v1619_v25 = vpop.f32.mrf.mxu2 }
 0x168   : > { %v1583_v26 = vpop.f32.mrf.mxu0 }
 0x169   : > { %v1600_v24 = vpop.f32.mrf.mxu1  ;;  %v1582_v27 = vadd.f32 %v1581_v21, %v1563_v11 }
 0x16a   : > { %v1601_v62 = vadd.f32 %v1600_v24, %v596_v29 }
 0x16b   : > { %1886 = vst [vmem:[%s3276_s26 + $0x78] sm:$0xff] %v1582_v27 }
 0x16c   : > { %v1620_v63 = vadd.f32 %v1619_v25, %v1601_v62 }
 0x16e   : > { %v1564_v30 = vpop.f32.mrf.mxu3 }
 0x16f   : > { %v1565_v31 = vadd.f32 %v1564_v30, %v1546_v28  ;;  %v1621_v33 = vpop.f32.mrf.mxu2 }
 0x170   : > { %v1652_v34 = vpop.f32.mrf.mxu0 }
 0x171   : > { %v1602_v32 = vpop.f32.mrf.mxu1  ;;  %v1584_v36 = vadd.f32 %v1583_v26, %v1565_v31  ;;  %v1653_v39 = vadd.f32 %v1652_v34, %v597_v37 }
 0x172   : > { %v1603_v5 = vadd.f32 %v1602_v32, %v596_v29 }
 0x173   : > { %1893 = vst [vmem:[%s3276_s26 + $0xb0] sm:$0xff] %v1584_v36 }
 0x174   : > { %v1622_v6 = vadd.f32 %v1621_v33, %v1603_v5 }
 0x176   : > { %v1633_v41 = vpop.f32.mrf.mxu3 }
 0x177   : > { %v1634_v42 = vadd.f32 %v1633_v41, %v1615_v38  ;;  %v1690_v44 = vpop.f32.mrf.mxu2  ;;  %v599_v41 = vperm.slane %v3266_v40, 5 }
 0x178   : > { %v1654_v46 = vpop.f32.mrf.mxu0 }
 0x179   : > { %v1671_v43 = vpop.f32.mrf.mxu1  ;;  %1873 = vst [vmem:[%s3276_s26 + $0x10] sm:$0xff] %v1634_v42  ;;  %v1655_v52 = vadd.f32 %v1654_v46, %v597_v37 }
 0x17a   : > { %v1672_v45 = vadd.f32 %v1671_v43, %v1653_v39 }
 0x17c   : > { %v1691_v48 = vadd.f32 %v1690_v44, %v1672_v45 }
 0x17e   : > { %1874 = vst [vmem:[%s3276_s26 + $0x18] sm:$0xff] %v1691_v48  ;;  %v1635_v53 = vpop.f32.mrf.mxu3 }
 0x17f   : > { %v1636_v51 = vadd.f32 %v1635_v53, %v1617_v49  ;;  %v1692_v55 = vpop.f32.mrf.mxu2 }
 0x180   : > { %v1657_v50 = vpop.f32.mrf.mxu0 }
 0x181   : > { %v1673_v54 = vpop.f32.mrf.mxu1  ;;  %1880 = vst [vmem:[%s3276_s26 + $0x48] sm:$0xff] %v1636_v51  ;;  %v1658_v60 = vadd.f32 %v1657_v50, %v597_v37 }
 0x182   : > { %v1674_v56 = vadd.f32 %v1673_v54, %v1655_v52 }
 0x184   : > { %v1693_v57 = vadd.f32 %v1692_v55, %v1674_v56 }
 0x186   : > { %1881 = vst [vmem:[%s3276_s26 + $0x50] sm:$0xff] %v1693_v57  ;;  %v1638_v61 = vpop.f32.mrf.mxu3 }
 0x187   : > { %v1639_v0 = vadd.f32 %v1638_v61, %v1620_v63  ;;  %v1695_v2 = vpop.f32.mrf.mxu2 }
 0x188   : > { %v1659_v4 = vpop.f32.mrf.mxu0 }
 0x189   : > { %v1676_v1 = vpop.f32.mrf.mxu1  ;;  %1887 = vst [vmem:[%s3276_s26 + $0x80] sm:$0xff] %v1639_v0  ;;  %v1660_v7 = vadd.f32 %v1659_v4, %v597_v37 }
 0x18a   : > { %v1677_v3 = vadd.f32 %v1676_v1, %v1658_v60  ;;  %v600_v60 = vperm.slane %v3266_v40, 6 }
 0x18c   : > { %v1696_v59 = vadd.f32 %v1695_v2, %v1677_v3 }
 0x18e   : > { %1888 = vst [vmem:[%s3276_s26 + $0x88] sm:$0xff] %v1696_v59  ;;  %v1640_v8 = vpop.f32.mrf.mxu3 }
 0x18f   : > { %v1641_v58 = vadd.f32 %v1640_v8, %v1622_v6  ;;  %v1697_v10 = vpop.f32.mrf.mxu2 }
 0x190   : > { %v1728_v13 = vpop.f32.mrf.mxu0 }
 0x191   : > { %v1678_v9 = vpop.f32.mrf.mxu1  ;;  %1894 = vst [vmem:[%s3276_s26 + $0xb8] sm:$0xff] %v1641_v58 }
 0x192   : > { %v1679_v12 = vadd.f32 %v1678_v9, %v1660_v7 }
 0x194   : > { %v1698_v14 = vadd.f32 %v1697_v10, %v1679_v12 }
 0x196   : > { %1895 = vst [vmem:[%s3276_s26 + $0xc0] sm:$0xff] %v1698_v14  ;;  %v1709_v16 = vpop.f32.mrf.mxu3 }
 0x197   : > { %v1710_v17 = vadd.f32 %v1709_v16, %v598_v15  ;;  %v1766_v20 = vpop.f32.mrf.mxu2 }
 0x198   : > { %v1730_v21 = vpop.f32.mrf.mxu0  ;;  %v1767_v45 = vadd.f32 %v1766_v20, %v599_v41 }
 0x199   : > { %v1747_v19 = vpop.f32.mrf.mxu1  ;;  %v1729_v18 = vadd.f32 %v1728_v13, %v1710_v17 }
 0x19b   : > { %v1748_v23 = vadd.f32 %v1747_v19, %v1729_v18 }
 0x19d   : > { %1875 = vst [vmem:[%s3276_s26 + $0x20] sm:$0xff] %v1748_v23 }
 0x19e   : > { %v1711_v22 = vpop.f32.mrf.mxu3 }
 0x19f   : > { %v1712_v11 = vadd.f32 %v1711_v22, %v598_v15  ;;  %v1768_v25 = vpop.f32.mrf.mxu2 }
 0x1a0   : > { %v1733_v26 = vpop.f32.mrf.mxu0  ;;  %v1769_v53 = vadd.f32 %v1768_v25, %v599_v41 }
 0x1a1   : > { %v1749_v24 = vpop.f32.mrf.mxu1  ;;  %v1731_v27 = vadd.f32 %v1730_v21, %v1712_v11 }
 0x1a3   : > { %v1750_v28 = vadd.f32 %v1749_v24, %v1731_v27 }
 0x1a5   : > { %1882 = vst [vmem:[%s3276_s26 + $0x58] sm:$0xff] %v1750_v28 }
 0x1a6   : > { %v1714_v29 = vpop.f32.mrf.mxu3 }
 0x1a7   : > { %v1715_v30 = vadd.f32 %v1714_v29, %v598_v15  ;;  %v1771_v34 = vpop.f32.mrf.mxu2 }
 0x1a8   : > { %v1735_v32 = vpop.f32.mrf.mxu0  ;;  %v1772_v57 = vadd.f32 %v1771_v34, %v599_v41 }
 0x1a9   : > { %v1752_v31 = vpop.f32.mrf.mxu1  ;;  %v1734_v33 = vadd.f32 %v1733_v26, %v1715_v30 }
 0x1ab   : > { %v1753_v35 = vadd.f32 %v1752_v31, %v1734_v33 }
 0x1ad   : > { %1889 = vst [vmem:[%s3276_s26 + $0x90] sm:$0xff] %v1753_v35 }
 0x1ae   : > { %v1716_v36 = vpop.f32.mrf.mxu3 }
 0x1af   : > { %v1717_v37 = vadd.f32 %v1716_v36, %v598_v15  ;;  %v1773_v44 = vpop.f32.mrf.mxu2 }
 0x1b0   : > { %v1804_v39 = vpop.f32.mrf.mxu0  ;;  %v1774_v5 = vadd.f32 %v1773_v44, %v599_v41 }
 0x1b1   : > { %v1754_v38 = vpop.f32.mrf.mxu1  ;;  %v1736_v42 = vadd.f32 %v1735_v32, %v1717_v37 }
 0x1b3   : > { %v1755_v43 = vadd.f32 %v1754_v38, %v1736_v42 }
 0x1b5   : > { %1896 = vst [vmem:[%s3276_s26 + $0xc8] sm:$0xff] %v1755_v43 }
 0x1b6   : > { %v1785_v46 = vpop.f32.mrf.mxu3 }
 0x1b7   : > { %v1786_v47 = vadd.f32 %v1785_v46, %v1767_v45  ;;  %v1842_v51 = vpop.f32.mrf.mxu2 }
 0x1b8   : > { %v1806_v49 = vpop.f32.mrf.mxu0 }
 0x1b9   : > { %v1823_v48 = vpop.f32.mrf.mxu1  ;;  %v1805_v52 = vadd.f32 %v1804_v39, %v1786_v47 }
 0x1ba   : > { %v1824_v3 = vadd.f32 %v1823_v48, %v600_v60 }
 0x1bb   : > { %1876 = vst [vmem:[%s3276_s26 + $0x28] sm:$0xff] %v1805_v52 }
 0x1bc   : > { %v1843_v6 = vadd.f32 %v1842_v51, %v1824_v3 }
 0x1be   : > { %v1787_v54 = vpop.f32.mrf.mxu3 }
 0x1bf   : > { %v1788_v55 = vadd.f32 %v1787_v54, %v1769_v53  ;;  %v1844_v0 = vpop.f32.mrf.mxu2 }
 0x1c0   : > { %v1809_v56 = vpop.f32.mrf.mxu0 }
 0x1c1   : > { %v1807_v50 = vadd.f32 %v1806_v49, %v1788_v55  ;;  %v1825_v62 = vpop.f32.mrf.mxu1 }
 0x1c2   : > { %v1826_v12 = vadd.f32 %v1825_v62, %v600_v60 }
 0x1c3   : > { %1883 = vst [vmem:[%s3276_s26 + $0x60] sm:$0xff] %v1807_v50 }
 0x1c4   : > { %v1845_v16 = vadd.f32 %v1844_v0, %v1826_v12 }
 0x1c6   : > { %v1790_v63 = vpop.f32.mrf.mxu3 }
 0x1c7   : > { %v1791_v61 = vadd.f32 %v1790_v63, %v1772_v57  ;;  %v1847_v40 = vpop.f32.mrf.mxu2 }
 0x1c8   : > { %v1811_v1 = vpop.f32.mrf.mxu0 }
 0x1c9   : > { %v1810_v2 = vadd.f32 %v1809_v56, %v1791_v61  ;;  %v1828_v4 = vpop.f32.mrf.mxu1 }
 0x1ca   : > { %v1829_v58 = vadd.f32 %v1828_v4, %v600_v60 }
 0x1cb   : > { %1890 = vst [vmem:[%s3276_s26 + $0x98] sm:$0xff] %v1810_v2 }
 0x1cc   : > { %v1848_v13 = vadd.f32 %v1847_v40, %v1829_v58 }
 0x1ce   : > { %v1792_v59 = vpop.f32.mrf.mxu3 }
 0x1cf   : > { %v1793_v7 = vadd.f32 %v1792_v59, %v1774_v5  ;;  %v1849_v18 = vpop.f32.mrf.mxu2 }
 0x1d0   : > { %v1861_v8 = vpop.f32.mrf.mxu0 }
 0x1d1   : > { %v1812_v9 = vadd.f32 %v1811_v1, %v1793_v7  ;;  %v1862_v10 = vadd.f32 %v1861_v8, %v1843_v6  ;;  %v1830_v14 = vpop.f32.mrf.mxu1 }
 0x1d2   : > { %v1831_v20 = vadd.f32 %v1830_v14, %v600_v60 }
 0x1d3   : > { %1897 = vst [vmem:[%s3276_s26 + $0xd0] sm:$0xff] %v1812_v9 }
 0x1d4   : > { %1877 = vst [vmem:[%s3276_s26 + $0x30] sm:$0xff] %v1862_v10  ;;  %v1850_v23 = vadd.f32 %v1849_v18, %v1831_v20 }
 0x1d6   : > { %v1866_v15 = vpop.f32.mrf.mxu3 }
 0x1d7   : > { %v1867_v17 = vadd.f32 %v1866_v15, %v1848_v13 }
 0x1d8   : > { %v1863_v19 = vpop.f32.mrf.mxu0 }
 0x1d9   : > { %1891 = vst [vmem:[%s3276_s26 + $0xa0] sm:$0xff] %v1867_v17  ;;  %v1864_v21 = vadd.f32 %v1863_v19, %v1845_v16 }
 0x1db   : > { %1884 = vst [vmem:[%s3276_s26 + $0x68] sm:$0xff] %v1864_v21 }
 0x1de   : > { %v1868_v22 = vpop.f32.mrf.mxu3 }
 0x1df   : > { %v1869_v11 = vadd.f32 %v1868_v22, %v1850_v23 }
 0x1e1   : > { %1898 = vst [vmem:[%s3276_s26 + $0xd8] sm:$0xff] %v1869_v11 }
 0x1e2   : > { %3000 = shalt.err (!%p2997_p8)
}
 0x1e3   : > { %s3044_s17 = smov 896   ;;  %s3045_s23 = smov 56  }
 0x1e4   : > { %2893 = dma.vmem_to_hbm [thread:$0]  (%p3114_p5), %s1914_s9, 3584, %s1916_s10, %s1900_s22, %s3044_s17, %s3044_s17, %s3045_s23  }
 0x1e5 PF: > { %p2905_p9 = scmp.ge.s32.totalorder %s3039_s21, 2  ;;  %s1930_s26 = sand.u32 1, %s3027_s18  }
 0x1e6   : > { %s1931_s30 = scalar_lea.sflag [#allocation4], %s1930_s26 }
 0x1e7   : > { %p2900_p10 = pnand %p2905_p9, %p3118_p6 }
 0x1e9   : > { %p2901_p11 = pneg %p2900_p10 }
 0x1eb   : > { %3022 = dma.done.wait (%p2901_p11), %s1931_s30, 3584  }
 0x1ec   : > { %3024 = vsyncadd (%p2901_p11), %s1931_s30, 4294963712  ;;  %p16_p12 = scmp.ge.s32.totalorder %s3101_s24, 4   ;;  %s3360_s18 = smov %s3031_s19 }
 0x1ed   : > { %s3361_s19 = smov %s3035_s20  ;;  %s3362_s20 = smov %s3112_s27 }
 0x1ee   : > { %s3363_s21 = smov %s3101_s24  ;;  %18 = sbr.rel (!%p16_p12) target bundleno = 4 (0x4), region = 80 }
 0x1f3   :  { %1937 = vsyncpa [#allocation3], 1 }
 0x1f4   :  { %1939 = vsyncpa [#allocation3 + $0x1], 1 }
 0x1f5   :  { %1940 = vsyncpa [#allocation4], 1 }
 0x1f6   :  { %1942 = vsyncpa [#allocation4 + $0x1], 1 }

</bundles_post_ra>
